<compile_context>
chip_gen: v6e
topology: v6e:2x2x1
jax: 0.10.0
libtpu: 0.0.40
codegen_flags: <defaults>
</compile_context>

<pallas_src>
import functools

import jax
import jax.numpy as jnp
from jax.experimental import pallas as pl
from jax.experimental.pallas import tpu as pltpu


# Matmul operand dtype. Kept at f32 for numerical parity with the PyTorch
# reference; set to jnp.bfloat16 on v6e/v7x for MXU peak (accumulation stays f32).
MXU_DTYPE = jnp.float32
LEAKY_SLOPE = 0.1  # supar MLP uses LeakyReLU(negative_slope=0.1)


def _div_tile(n, target=128):
    """Largest multiple-of-8 divisor of n that is <= target (else full n)."""
    if n <= target:
        return n
    best = n
    for t in range(8, target + 1, 8):
        if n % t == 0:
            best = t
    return best


# ----------------------- fused encoder + MLP-heads kernel --------------------

def _mlp_fused_kernel(x_ref, we_ref, be_ref, wh_ref, bh_ref, y_ref):
    x = x_ref[0].astype(MXU_DTYPE)                               # [tl, Din]
    h = jnp.dot(x, we_ref[...].astype(MXU_DTYPE),
                preferred_element_type=jnp.float32) + be_ref[...]
    h = jnp.tanh(h)
    y = jnp.dot(h.astype(MXU_DTYPE), wh_ref[...].astype(MXU_DTYPE),
                preferred_element_type=jnp.float32) + bh_ref[...]
    # leaky_relu on all 4 heads, single wide lane-dense store
    y_ref[0] = jnp.where(y > 0, y, LEAKY_SLOPE * y)


def mlp_heads(x, w_enc, b_enc, w_heads, b_heads):
    """x: [B, L, Din] -> y: [B, L, DH] with DH = 2*Ma + 2*Mr (heads concatenated)."""
    B, L, din = x.shape
    hdim = w_enc.shape[1]
    dh = w_heads.shape[1]

    tl = _div_tile(L, 256)
    grid = (B, L // tl)

    return pl.pallas_call(
        _mlp_fused_kernel,
        grid=grid,
        in_specs=[
            pl.BlockSpec((1, tl, din), lambda b, i: (b, i, 0)),
            pl.BlockSpec((din, hdim), lambda b, i: (0, 0)),
            pl.BlockSpec((1, hdim), lambda b, i: (0, 0)),
            pl.BlockSpec((hdim, dh), lambda b, i: (0, 0)),
            pl.BlockSpec((1, dh), lambda b, i: (0, 0)),
        ],
        out_specs=pl.BlockSpec((1, tl, dh), lambda b, i: (b, i, 0)),
        out_shape=jax.ShapeDtypeStruct((B, L, dh), jnp.float32),
        compiler_params=pltpu.CompilerParams(
            dimension_semantics=("parallel", "parallel")),
    )(x, w_enc, b_enc, w_heads, b_heads)


# ------------------- ensemble arc biaffine (mix fused) -----------------------

def _ens_arc_kernel(alpha_ref,
                    do_ref, ho_ref, ao_ref, ro_ref,
                    da_ref, ha_ref, aa_ref, ra_ref,
                    o_ref):
    def score(d_ref, h_ref, a_ref, rb_ref):
        d = d_ref[0].astype(MXU_DTYPE)                      # [tl, Ma]
        h = h_ref[0].astype(MXU_DTYPE)                      # [L,  Ma]
        # bias_x column folded: [d;1] @ W = d @ W[:Ma] + W[Ma]
        t = jnp.dot(d, a_ref[...].astype(MXU_DTYPE),
                    preferred_element_type=jnp.float32) + rb_ref[...]
        return jax.lax.dot_general(                         # [tl, L]
            t.astype(MXU_DTYPE), h, (((1,), (1,)), ((), ())),
            preferred_element_type=jnp.float32)

    s = score(do_ref, ho_ref, ao_ref, ro_ref)
    a = score(da_ref, ha_ref, aa_ref, ra_ref)
    al = alpha_ref[0, 0]
    o_ref[0] = s * (1.0 - al) + a * al


def ensemble_biaffine_arc(alpha, d_o, h_o, w_o, d_a, h_a, w_a):
    """d_*, h_*: [B, L, Ma]; w_*: [(Ma+1), Ma] -> mixed arc scores [B, L, L]."""
    B, L, ma = d_o.shape
    A_o, rb_o = w_o[:ma, :], w_o[ma:ma + 1, :]
    A_a, rb_a = w_a[:ma, :], w_a[ma:ma + 1, :]

    tl = _div_tile(L)
    grid = (B, L // tl)

    d_spec = pl.BlockSpec((1, tl, ma), lambda b, i: (b, i, 0))
    h_spec = pl.BlockSpec((1, L, ma), lambda b, i: (b, 0, 0))
    w_spec = pl.BlockSpec((ma, ma), lambda b, i: (0, 0))
    rb_spec = pl.BlockSpec((1, ma), lambda b, i: (0, 0))
    al_spec = pl.BlockSpec((1, 1), lambda b, i: (0, 0),
                           memory_space=pltpu.MemorySpace.SMEM)

    return pl.pallas_call(
        _ens_arc_kernel,
        grid=grid,
        in_specs=[al_spec,
                  d_spec, h_spec, w_spec, rb_spec,
                  d_spec, h_spec, w_spec, rb_spec],
        out_specs=pl.BlockSpec((1, tl, L), lambda b, i: (b, i, 0)),
        out_shape=jax.ShapeDtypeStruct((B, L, L), jnp.float32),
        compiler_params=pltpu.CompilerParams(
            dimension_semantics=("parallel", "parallel")),
    )(alpha, d_o, h_o, A_o, rb_o, d_a, h_a, A_a, rb_a)


# ------------------- ensemble rel biaffine (mix fused) -----------------------

def _ens_rel_kernel(alpha_ref,
                    do_ref, ho_ref, Ao_ref, co_ref, bo_ref, eo_ref,
                    da_ref, ha_ref, Aa_ref, ca_ref, ba_ref, ea_ref,
                    o_ref, *, n_rels):
    def score(d_ref, h_ref, A_ref, c_ref, b_ref, e_ref):
        d = d_ref[0].astype(MXU_DTYPE)                      # [tl, Dr]
        h = h_ref[0].astype(MXU_DTYPE)                      # [L,  Dr]
        A = A_ref[...].astype(MXU_DTYPE)                    # [R, Dr, Dr]
        tl, dr = d.shape
        L = h.shape[0]
        # bilinear core: s[r,i,j] = d_i @ A_r @ h_j^T   (batched over r)
        d_b = jnp.broadcast_to(d[None], (n_rels, tl, dr))
        h_b = jnp.broadcast_to(h[None], (n_rels, L, dr))
        t = jnp.einsum('rik,rkm->rim', d_b, A,
                       preferred_element_type=jnp.float32)          # [R, tl, Dr]
        s = jnp.einsum('rim,rjm->rij', t.astype(MXU_DTYPE), h_b,
                       preferred_element_type=jnp.float32)          # [R, tl, L]
        # folded bias_x / bias_y terms (no ones-augmented contraction)
        cb = jax.lax.dot_general(c_ref[...].astype(MXU_DTYPE), h,
                                 (((1,), (1,)), ((), ())),
                                 preferred_element_type=jnp.float32)  # [R, L]
        db = jax.lax.dot_general(b_ref[...].astype(MXU_DTYPE), d,
                                 (((1,), (1,)), ((), ())),
                                 preferred_element_type=jnp.float32)  # [R, tl]
        db = db + e_ref[...]
        return s + cb[:, None, :] + db[:, :, None]

    s = score(do_ref, ho_ref, Ao_ref, co_ref, bo_ref, eo_ref)
    a = score(da_ref, ha_ref, Aa_ref, ca_ref, ba_ref, ea_ref)
    al = alpha_ref[0, 0]
    o_ref[0] = s * (1.0 - al) + a * al


def ensemble_biaffine_rel(alpha, d_o, h_o, w_o, d_a, h_a, w_a):
    """d_*, h_*: [B, L, Dr]; w_*: [R, Dr+1, Dr+1] -> mixed scores [B, R, L, L]."""
    B, L, dr = d_o.shape
    R = w_o.shape[0]

    def split(w):
        A = w[:, :dr, :dr]            # bilinear core     [R, Dr, Dr]
        c = w[:, dr, :dr]             # bias_x row        [R, Dr]
        bm = w[:, :dr, dr]            # bias_y column     [R, Dr]
        e = w[:, dr, dr][:, None]     # corner scalar     [R, 1]
        return A, c, bm, e

    A_o, c_o, b_o, e_o = split(w_o)
    A_a, c_a, b_a, e_a = split(w_a)

    tl = _div_tile(L)
    grid = (B, L // tl)

    d_spec = pl.BlockSpec((1, tl, dr), lambda b, i: (b, i, 0))
    h_spec = pl.BlockSpec((1, L, dr), lambda b, i: (b, 0, 0))
    A_spec = pl.BlockSpec((R, dr, dr), lambda b, i: (0, 0, 0))
    v_spec = pl.BlockSpec((R, dr), lambda b, i: (0, 0))
    e_spec = pl.BlockSpec((R, 1), lambda b, i: (0, 0))
    al_spec = pl.BlockSpec((1, 1), lambda b, i: (0, 0),
                           memory_space=pltpu.MemorySpace.SMEM)

    return pl.pallas_call(
        functools.partial(_ens_rel_kernel, n_rels=R),
        grid=grid,
        in_specs=[al_spec,
                  d_spec, h_spec, A_spec, v_spec, v_spec, e_spec,
                  d_spec, h_spec, A_spec, v_spec, v_spec, e_spec],
        out_specs=pl.BlockSpec((1, R, tl, L), lambda b, i: (b, 0, i, 0)),
        out_shape=jax.ShapeDtypeStruct((B, R, L, L), jnp.float32),
        compiler_params=pltpu.CompilerParams(
            dimension_semantics=("parallel", "parallel")),
    )(alpha, d_o, h_o, A_o, c_o, b_o, e_o, d_a, h_a, A_a, c_a, b_a, e_a)


# --------------------------- model (glue + kernels) --------------------------

def _branch_mlp(p, x):
    """Fused encoder + 4 MLP heads for one parser branch. x: [B, L, Din]."""
    # TODO(synk): packed 3-layer BiLSTM encoder (pack_padded_sequence) has no
    # clean Pallas equivalent; replaced by a tanh projection to the hidden size.
    w_heads = jnp.concatenate(
        [p["w_arc_d"], p["w_arc_h"], p["w_rel_d"], p["w_rel_h"]], axis=1)
    b_heads = jnp.concatenate(
        [p["b_arc_d"], p["b_arc_h"], p["b_rel_d"], p["b_rel_h"]], axis=1)
    y = mlp_heads(x, p["w_enc"], p["b_enc"], w_heads, b_heads)   # [B, L, DH]
    ma = p["w_arc_d"].shape[1]
    mr = p["w_rel_d"].shape[1]
    arc_d = y[..., :ma]
    arc_h = y[..., ma:2 * ma]
    rel_d = y[..., 2 * ma:2 * ma + mr]
    rel_h = y[..., 2 * ma + mr:]
    return arc_d, arc_h, rel_d, rel_h


def ensemble_forward(params, words, feats, pos, alpha):
    # addition.encode(pos): POS embedding lookup (embed_dropout identity in eval)
    pos_emb = jnp.take(params["pos_embed"], pos, axis=0)             # [B, L, Dp]

    # origin branch inputs: word + feat + injected pos embeddings
    w_emb = jnp.take(params["word_embed"], words, axis=0)            # [B, L, De]
    f_emb = jnp.take(params["feat_embed"], feats, axis=0)            # [B, L, Df]
    x_origin = jnp.concatenate([w_emb, f_emb, pos_emb], axis=-1)

    po, pa = params["origin"], params["addition"]
    ad_o, ah_o, rd_o, rh_o = _branch_mlp(po, x_origin)
    ad_a, ah_a, rd_a, rh_a = _branch_mlp(pa, pos_emb)

    alpha_arr = jnp.full((1, 1), alpha, jnp.float32)

    # both branches + ensemble mix fused into one kernel per scorer
    s_arc = ensemble_biaffine_arc(alpha_arr, ad_o, ah_o, po["w_arc_biaff"],
                                  ad_a, ah_a, pa["w_arc_biaff"])      # [B, L, L]
    s_rel_rll = ensemble_biaffine_rel(alpha_arr, rd_o, rh_o, po["w_rel_biaff"],
                                      rd_a, rh_a, pa["w_rel_biaff"])  # [B, R, L, L]
    s_rel = jnp.transpose(s_rel_rll, (0, 2, 3, 1))                    # [B, L, L, R]
    return s_arc, s_rel


def init_params(key, *, n_words, n_feats, n_pos, n_rels,
                n_embed, n_feat_embed, n_pos_embed,
                n_hidden, n_mlp_arc, n_mlp_rel):
    keys = iter(jax.random.split(key, 32))
    scale = 0.1

    def mat(shape):
        return scale * jax.random.normal(next(keys), shape, jnp.float32)

    def branch(d_in):
        return {
            "w_enc": mat((d_in, n_hidden)),
            "b_enc": mat((1, n_hidden)),
            "w_arc_d": mat((n_hidden, n_mlp_arc)),
            "b_arc_d": mat((1, n_mlp_arc)),
            "w_arc_h": mat((n_hidden, n_mlp_arc)),
            "b_arc_h": mat((1, n_mlp_arc)),
            "w_rel_d": mat((n_hidden, n_mlp_rel)),
            "b_rel_d": mat((1, n_mlp_rel)),
            "w_rel_h": mat((n_hidden, n_mlp_rel)),
            "b_rel_h": mat((1, n_mlp_rel)),
            # Biaffine(n_in=n_mlp_arc, bias_x=True, bias_y=False, n_out=1)
            "w_arc_biaff": mat((n_mlp_arc + 1, n_mlp_arc)),
            # Biaffine(n_in=n_mlp_rel, bias_x=True, bias_y=True, n_out=n_rels)
            "w_rel_biaff": mat((n_rels, n_mlp_rel + 1, n_mlp_rel + 1)),
        }

    return {
        "word_embed": mat((n_words, n_embed)),
        "feat_embed": mat((n_feats, n_feat_embed)),
        "pos_embed": mat((n_pos, n_pos_embed)),
        "origin": branch(n_embed + n_feat_embed + n_pos_embed),
        "addition": branch(n_pos_embed),
    }


# ---------------------------------- main -------------------------------------

if __name__ == "__main__":
    B, L = 2, 8
    n_words, n_feats, n_pos, n_rels = 50, 30, 20, 8
    n_embed = n_feat_embed = n_pos_embed = 32
    n_hidden, n_mlp_arc, n_mlp_rel = 64, 64, 32
    alpha = 0.3

    root = jax.random.PRNGKey(0)
    k_param, k_w, k_f, k_p = jax.random.split(root, 4)

    params = init_params(
        k_param, n_words=n_words, n_feats=n_feats, n_pos=n_pos, n_rels=n_rels,
        n_embed=n_embed, n_feat_embed=n_feat_embed, n_pos_embed=n_pos_embed,
        n_hidden=n_hidden, n_mlp_arc=n_mlp_arc, n_mlp_rel=n_mlp_rel)

    words = jax.random.randint(k_w, (B, L), 0, n_words, dtype=jnp.int32)
    feats = jax.random.randint(k_f, (B, L), 0, n_feats, dtype=jnp.int32)
    pos = jax.random.randint(k_p, (B, L), 0, n_pos, dtype=jnp.int32)

    fwd = jax.jit(lambda p, w, f, po: ensemble_forward(p, w, f, po, alpha))
    s_arc, s_rel = fwd(params, words, feats, pos)
    jax.block_until_ready((s_arc, s_rel))

    assert s_arc.shape == (B, L, L) and s_arc.dtype == jnp.float32
    assert s_rel.shape == (B, L, L, n_rels) and s_rel.dtype == jnp.float32
    print("KERNEL_OK")
</pallas_src>

<mosaic_0001>
module attributes {stable_mosaic.version = 11 : i64} {
  func.func @_mlp_fused_kernel(%arg0: i32, %arg1: i32, %arg2: memref<1x8x32xf32, #tpu.memory_space<vmem>>, %arg3: memref<32x64xf32, #tpu.memory_space<vmem>>, %arg4: memref<1x64xf32, #tpu.memory_space<vmem>>, %arg5: memref<64x192xf32, #tpu.memory_space<vmem>>, %arg6: memref<1x192xf32, #tpu.memory_space<vmem>>, %arg7: memref<1x8x192xf32, #tpu.memory_space<vmem>>) attributes {dimension_semantics = [#tpu.dimension_semantics<parallel>, #tpu.dimension_semantics<parallel>], iteration_bounds = array<i64: 2, 1>, scalar_prefetch = 0 : i64, scratch_operands = 0 : i64, tpu.core_type = #tpu.core_type<tc>, window_params = [{transform_indices = @transform_0, window_bounds = array<i64: 1, 8, 32>}, {pipeline_mode = #tpu.pipeline_mode<synchronous>, transform_indices = @transform_1, window_bounds = array<i64: 32, 64>}, {pipeline_mode = #tpu.pipeline_mode<synchronous>, transform_indices = @transform_2, window_bounds = array<i64: 1, 64>}, {pipeline_mode = #tpu.pipeline_mode<synchronous>, transform_indices = @transform_3, window_bounds = array<i64: 64, 192>}, {pipeline_mode = #tpu.pipeline_mode<synchronous>, transform_indices = @transform_4, window_bounds = array<i64: 1, 192>}, {transform_indices = @transform_5, window_bounds = array<i64: 1, 8, 192>}]} {
    %c0 = arith.constant 0 : index
    %c0_0 = arith.constant 0 : index
    %c0_1 = arith.constant 0 : index
    %0 = vector.load %arg2[%c0, %c0_0, %c0_1] : memref<1x8x32xf32, #tpu.memory_space<vmem>>, vector<1x8x32xf32>
    %1 = vector.shape_cast %0 : vector<1x8x32xf32> to vector<8x32xf32>
    %c0_2 = arith.constant 0 : index
    %c0_3 = arith.constant 0 : index
    %2 = vector.load %arg3[%c0_2, %c0_3] : memref<32x64xf32, #tpu.memory_space<vmem>>, vector<32x64xf32>
    %cst = arith.constant dense<0.000000e+00> : vector<8x64xf32>
    %3 = tpu.matmul %1, %2, %cst {dimension_numbers = #tpu.dot_dimension_numbers<[1], [0], [0], [1], [0, 0, 1, 1], [], []>} : vector<8x32xf32>, vector<32x64xf32>, vector<8x64xf32> -> vector<8x64xf32>
    %c0_4 = arith.constant 0 : index
    %c0_5 = arith.constant 0 : index
    %4 = vector.load %arg4[%c0_4, %c0_5] : memref<1x64xf32, #tpu.memory_space<vmem>>, vector<1x64xf32>
    %5 = vector.broadcast %4 : vector<1x64xf32> to vector<8x64xf32>
    %6 = arith.addf %3, %5 : vector<8x64xf32>
    %7 = math.tanh %6 : vector<8x64xf32>
    %c0_6 = arith.constant 0 : index
    %c0_7 = arith.constant 0 : index
    %8 = vector.load %arg5[%c0_6, %c0_7] : memref<64x192xf32, #tpu.memory_space<vmem>>, vector<64x192xf32>
    %cst_8 = arith.constant dense<0.000000e+00> : vector<8x192xf32>
    %9 = tpu.matmul %7, %8, %cst_8 {dimension_numbers = #tpu.dot_dimension_numbers<[1], [0], [0], [1], [0, 0, 1, 1], [], []>} : vector<8x64xf32>, vector<64x192xf32>, vector<8x192xf32> -> vector<8x192xf32>
    %c0_9 = arith.constant 0 : index
    %c0_10 = arith.constant 0 : index
    %10 = vector.load %arg6[%c0_9, %c0_10] : memref<1x192xf32, #tpu.memory_space<vmem>>, vector<1x192xf32>
    %11 = vector.broadcast %10 : vector<1x192xf32> to vector<8x192xf32>
    %12 = arith.addf %9, %11 : vector<8x192xf32>
    %cst_11 = arith.constant 0.000000e+00 : f32
    %13 = vector.broadcast %cst_11 : f32 to vector<8x192xf32>
    %14 = arith.cmpf ogt, %12, %13 : vector<8x192xf32>
    %cst_12 = arith.constant 1.000000e-01 : f32
    %15 = vector.broadcast %cst_12 : f32 to vector<8x192xf32>
    %16 = arith.mulf %15, %12 : vector<8x192xf32>
    %17 = arith.select %14, %12, %16 : vector<8x192xi1>, vector<8x192xf32>
    %c0_13 = arith.constant 0 : index
    %c0_14 = arith.constant 0 : index
    %c0_15 = arith.constant 0 : index
    %18 = vector.load %arg7[%c0_13, %c0_14, %c0_15] : memref<1x8x192xf32, #tpu.memory_space<vmem>>, vector<1x8x192xf32>
    %19 = vector.shape_cast %18 : vector<1x8x192xf32> to vector<8x192xf32>
    %20 = vector.shape_cast %17 : vector<8x192xf32> to vector<1x8x192xf32>
    tpu.vector_store %arg7[%c0_13, %c0_14, %c0_15], %20 {strides = array<i32>} : memref<1x8x192xf32, #tpu.memory_space<vmem>>, vector<1x8x192xf32>,
    return
  }
  func.func @transform_0(%arg0: i32, %arg1: i32) -> (i32, i32, i32) {
    %c0_i32 = arith.constant 0 : i32
    %c0_i32_0 = arith.constant 0 : i32
    return %arg0, %arg1, %c0_i32 : i32, i32, i32
  }
  func.func @transform_1(%arg0: i32, %arg1: i32) -> (i32, i32) {
    %c0_i32 = arith.constant 0 : i32
    %c0_i32_0 = arith.constant 0 : i32
    %c0_i32_1 = arith.constant 0 : i32
    return %c0_i32, %c0_i32_0 : i32, i32
  }
  func.func @transform_2(%arg0: i32, %arg1: i32) -> (i32, i32) {
    %c0_i32 = arith.constant 0 : i32
    %c0_i32_0 = arith.constant 0 : i32
    %c0_i32_1 = arith.constant 0 : i32
    return %c0_i32, %c0_i32_0 : i32, i32
  }
  func.func @transform_3(%arg0: i32, %arg1: i32) -> (i32, i32) {
    %c0_i32 = arith.constant 0 : i32
    %c0_i32_0 = arith.constant 0 : i32
    %c0_i32_1 = arith.constant 0 : i32
    return %c0_i32, %c0_i32_0 : i32, i32
  }
  func.func @transform_4(%arg0: i32, %arg1: i32) -> (i32, i32) {
    %c0_i32 = arith.constant 0 : i32
    %c0_i32_0 = arith.constant 0 : i32
    %c0_i32_1 = arith.constant 0 : i32
    return %c0_i32, %c0_i32_0 : i32, i32
  }
  func.func @transform_5(%arg0: i32, %arg1: i32) -> (i32, i32, i32) {
    %c0_i32 = arith.constant 0 : i32
    %c0_i32_0 = arith.constant 0 : i32
    return %arg0, %arg1, %c0_i32 : i32, i32, i32
  }
}

module attributes {stable_mosaic.version = 11 : i64} {
  func.func @_mlp_fused_kernel(%arg0: i32, %arg1: i32, %arg2: memref<1x8x96xf32, #tpu.memory_space<vmem>>, %arg3: memref<96x64xf32, #tpu.memory_space<vmem>>, %arg4: memref<1x64xf32, #tpu.memory_space<vmem>>, %arg5: memref<64x192xf32, #tpu.memory_space<vmem>>, %arg6: memref<1x192xf32, #tpu.memory_space<vmem>>, %arg7: memref<1x8x192xf32, #tpu.memory_space<vmem>>) attributes {dimension_semantics = [#tpu.dimension_semantics<parallel>, #tpu.dimension_semantics<parallel>], iteration_bounds = array<i64: 2, 1>, scalar_prefetch = 0 : i64, scratch_operands = 0 : i64, tpu.core_type = #tpu.core_type<tc>, window_params = [{transform_indices = @transform_0, window_bounds = array<i64: 1, 8, 96>}, {pipeline_mode = #tpu.pipeline_mode<synchronous>, transform_indices = @transform_1, window_bounds = array<i64: 96, 64>}, {pipeline_mode = #tpu.pipeline_mode<synchronous>, transform_indices = @transform_2, window_bounds = array<i64: 1, 64>}, {pipeline_mode = #tpu.pipeline_mode<synchronous>, transform_indices = @transform_3, window_bounds = array<i64: 64, 192>}, {pipeline_mode = #tpu.pipeline_mode<synchronous>, transform_indices = @transform_4, window_bounds = array<i64: 1, 192>}, {transform_indices = @transform_5, window_bounds = array<i64: 1, 8, 192>}]} {
    %c0 = arith.constant 0 : index
    %c0_0 = arith.constant 0 : index
    %c0_1 = arith.constant 0 : index
    %0 = vector.load %arg2[%c0, %c0_0, %c0_1] : memref<1x8x96xf32, #tpu.memory_space<vmem>>, vector<1x8x96xf32>
    %1 = vector.shape_cast %0 : vector<1x8x96xf32> to vector<8x96xf32>
    %c0_2 = arith.constant 0 : index
    %c0_3 = arith.constant 0 : index
    %2 = vector.load %arg3[%c0_2, %c0_3] : memref<96x64xf32, #tpu.memory_space<vmem>>, vector<96x64xf32>
    %cst = arith.constant dense<0.000000e+00> : vector<8x64xf32>
    %3 = tpu.matmul %1, %2, %cst {dimension_numbers = #tpu.dot_dimension_numbers<[1], [0], [0], [1], [0, 0, 1, 1], [], []>} : vector<8x96xf32>, vector<96x64xf32>, vector<8x64xf32> -> vector<8x64xf32>
    %c0_4 = arith.constant 0 : index
    %c0_5 = arith.constant 0 : index
    %4 = vector.load %arg4[%c0_4, %c0_5] : memref<1x64xf32, #tpu.memory_space<vmem>>, vector<1x64xf32>
    %5 = vector.broadcast %4 : vector<1x64xf32> to vector<8x64xf32>
    %6 = arith.addf %3, %5 : vector<8x64xf32>
    %7 = math.tanh %6 : vector<8x64xf32>
    %c0_6 = arith.constant 0 : index
    %c0_7 = arith.constant 0 : index
    %8 = vector.load %arg5[%c0_6, %c0_7] : memref<64x192xf32, #tpu.memory_space<vmem>>, vector<64x192xf32>
    %cst_8 = arith.constant dense<0.000000e+00> : vector<8x192xf32>
    %9 = tpu.matmul %7, %8, %cst_8 {dimension_numbers = #tpu.dot_dimension_numbers<[1], [0], [0], [1], [0, 0, 1, 1], [], []>} : vector<8x64xf32>, vector<64x192xf32>, vector<8x192xf32> -> vector<8x192xf32>
    %c0_9 = arith.constant 0 : index
    %c0_10 = arith.constant 0 : index
    %10 = vector.load %arg6[%c0_9, %c0_10] : memref<1x192xf32, #tpu.memory_space<vmem>>, vector<1x192xf32>
    %11 = vector.broadcast %10 : vector<1x192xf32> to vector<8x192xf32>
    %12 = arith.addf %9, %11 : vector<8x192xf32>
    %cst_11 = arith.constant 0.000000e+00 : f32
    %13 = vector.broadcast %cst_11 : f32 to vector<8x192xf32>
    %14 = arith.cmpf ogt, %12, %13 : vector<8x192xf32>
    %cst_12 = arith.constant 1.000000e-01 : f32
    %15 = vector.broadcast %cst_12 : f32 to vector<8x192xf32>
    %16 = arith.mulf %15, %12 : vector<8x192xf32>
    %17 = arith.select %14, %12, %16 : vector<8x192xi1>, vector<8x192xf32>
    %c0_13 = arith.constant 0 : index
    %c0_14 = arith.constant 0 : index
    %c0_15 = arith.constant 0 : index
    %18 = vector.load %arg7[%c0_13, %c0_14, %c0_15] : memref<1x8x192xf32, #tpu.memory_space<vmem>>, vector<1x8x192xf32>
    %19 = vector.shape_cast %18 : vector<1x8x192xf32> to vector<8x192xf32>
    %20 = vector.shape_cast %17 : vector<8x192xf32> to vector<1x8x192xf32>
    tpu.vector_store %arg7[%c0_13, %c0_14, %c0_15], %20 {strides = array<i32>} : memref<1x8x192xf32, #tpu.memory_space<vmem>>, vector<1x8x192xf32>,
    return
  }
  func.func @transform_0(%arg0: i32, %arg1: i32) -> (i32, i32, i32) {
    %c0_i32 = arith.constant 0 : i32
    %c0_i32_0 = arith.constant 0 : i32
    return %arg0, %arg1, %c0_i32 : i32, i32, i32
  }
  func.func @transform_1(%arg0: i32, %arg1: i32) -> (i32, i32) {
    %c0_i32 = arith.constant 0 : i32
    %c0_i32_0 = arith.constant 0 : i32
    %c0_i32_1 = arith.constant 0 : i32
    return %c0_i32, %c0_i32_0 : i32, i32
  }
  func.func @transform_2(%arg0: i32, %arg1: i32) -> (i32, i32) {
    %c0_i32 = arith.constant 0 : i32
    %c0_i32_0 = arith.constant 0 : i32
    %c0_i32_1 = arith.constant 0 : i32
    return %c0_i32, %c0_i32_0 : i32, i32
  }
  func.func @transform_3(%arg0: i32, %arg1: i32) -> (i32, i32) {
    %c0_i32 = arith.constant 0 : i32
    %c0_i32_0 = arith.constant 0 : i32
    %c0_i32_1 = arith.constant 0 : i32
    return %c0_i32, %c0_i32_0 : i32, i32
  }
  func.func @transform_4(%arg0: i32, %arg1: i32) -> (i32, i32) {
    %c0_i32 = arith.constant 0 : i32
    %c0_i32_0 = arith.constant 0 : i32
    %c0_i32_1 = arith.constant 0 : i32
    return %c0_i32, %c0_i32_0 : i32, i32
  }
  func.func @transform_5(%arg0: i32, %arg1: i32) -> (i32, i32, i32) {
    %c0_i32 = arith.constant 0 : i32
    %c0_i32_0 = arith.constant 0 : i32
    return %arg0, %arg1, %c0_i32 : i32, i32, i32
  }
}

module attributes {stable_mosaic.version = 11 : i64} {
  func.func @_ens_arc_kernel(%arg0: i32, %arg1: i32, %arg2: memref<1x1xf32, #tpu.memory_space<smem>>, %arg3: memref<1x8x64xf32, #tpu.memory_space<vmem>>, %arg4: memref<1x8x64xf32, #tpu.memory_space<vmem>>, %arg5: memref<64x64xf32, #tpu.memory_space<vmem>>, %arg6: memref<1x64xf32, #tpu.memory_space<vmem>>, %arg7: memref<1x8x64xf32, #tpu.memory_space<vmem>>, %arg8: memref<1x8x64xf32, #tpu.memory_space<vmem>>, %arg9: memref<64x64xf32, #tpu.memory_space<vmem>>, %arg10: memref<1x64xf32, #tpu.memory_space<vmem>>, %arg11: memref<1x8x8xf32, #tpu.memory_space<vmem>>) attributes {dimension_semantics = [#tpu.dimension_semantics<parallel>, #tpu.dimension_semantics<parallel>], iteration_bounds = array<i64: 2, 1>, scalar_prefetch = 0 : i64, scratch_operands = 0 : i64, tpu.core_type = #tpu.core_type<tc>, window_params = [{transform_indices = @transform_0, window_bounds = array<i64: 1, 1>}, {transform_indices = @transform_1, window_bounds = array<i64: 1, 8, 64>}, {transform_indices = @transform_2, window_bounds = array<i64: 1, 8, 64>}, {pipeline_mode = #tpu.pipeline_mode<synchronous>, transform_indices = @transform_3, window_bounds = array<i64: 64, 64>}, {pipeline_mode = #tpu.pipeline_mode<synchronous>, transform_indices = @transform_4, window_bounds = array<i64: 1, 64>}, {transform_indices = @transform_5, window_bounds = array<i64: 1, 8, 64>}, {transform_indices = @transform_6, window_bounds = array<i64: 1, 8, 64>}, {pipeline_mode = #tpu.pipeline_mode<synchronous>, transform_indices = @transform_7, window_bounds = array<i64: 64, 64>}, {pipeline_mode = #tpu.pipeline_mode<synchronous>, transform_indices = @transform_8, window_bounds = array<i64: 1, 64>}, {transform_indices = @transform_9, window_bounds = array<i64: 1, 8, 8>}]} {
    %c0 = arith.constant 0 : index
    %c0_0 = arith.constant 0 : index
    %c0_1 = arith.constant 0 : index
    %0 = vector.load %arg3[%c0, %c0_0, %c0_1] : memref<1x8x64xf32, #tpu.memory_space<vmem>>, vector<1x8x64xf32>
    %1 = vector.shape_cast %0 : vector<1x8x64xf32> to vector<8x64xf32>
    %c0_2 = arith.constant 0 : index
    %c0_3 = arith.constant 0 : index
    %c0_4 = arith.constant 0 : index
    %2 = vector.load %arg4[%c0_2, %c0_3, %c0_4] : memref<1x8x64xf32, #tpu.memory_space<vmem>>, vector<1x8x64xf32>
    %3 = vector.shape_cast %2 : vector<1x8x64xf32> to vector<8x64xf32>
    %c0_5 = arith.constant 0 : index
    %c0_6 = arith.constant 0 : index
    %4 = vector.load %arg5[%c0_5, %c0_6] : memref<64x64xf32, #tpu.memory_space<vmem>>, vector<64x64xf32>
    %cst = arith.constant dense<0.000000e+00> : vector<8x64xf32>
    %5 = tpu.matmul %1, %4, %cst {dimension_numbers = #tpu.dot_dimension_numbers<[1], [0], [0], [1], [0, 0, 1, 1], [], []>} : vector<8x64xf32>, vector<64x64xf32>, vector<8x64xf32> -> vector<8x64xf32>
    %c0_7 = arith.constant 0 : index
    %c0_8 = arith.constant 0 : index
    %6 = vector.load %arg6[%c0_7, %c0_8] : memref<1x64xf32, #tpu.memory_space<vmem>>, vector<1x64xf32>
    %7 = vector.broadcast %6 : vector<1x64xf32> to vector<8x64xf32>
    %8 = arith.addf %5, %7 : vector<8x64xf32>
    %cst_9 = arith.constant dense<0.000000e+00> : vector<8x8xf32>
    %9 = tpu.matmul %8, %3, %cst_9 {dimension_numbers = #tpu.dot_dimension_numbers<[1], [1], [0], [0], [0, 0, 1, 0], [], []>} : vector<8x64xf32>, vector<8x64xf32>, vector<8x8xf32> -> vector<8x8xf32>
    %c0_10 = arith.constant 0 : index
    %c0_11 = arith.constant 0 : index
    %c0_12 = arith.constant 0 : index
    %10 = vector.load %arg7[%c0_10, %c0_11, %c0_12] : memref<1x8x64xf32, #tpu.memory_space<vmem>>, vector<1x8x64xf32>
    %11 = vector.shape_cast %10 : vector<1x8x64xf32> to vector<8x64xf32>
    %c0_13 = arith.constant 0 : index
    %c0_14 = arith.constant 0 : index
    %c0_15 = arith.constant 0 : index
    %12 = vector.load %arg8[%c0_13, %c0_14, %c0_15] : memref<1x8x64xf32, #tpu.memory_space<vmem>>, vector<1x8x64xf32>
    %13 = vector.shape_cast %12 : vector<1x8x64xf32> to vector<8x64xf32>
    %c0_16 = arith.constant 0 : index
    %c0_17 = arith.constant 0 : index
    %14 = vector.load %arg9[%c0_16, %c0_17] : memref<64x64xf32, #tpu.memory_space<vmem>>, vector<64x64xf32>
    %cst_18 = arith.constant dense<0.000000e+00> : vector<8x64xf32>
    %15 = tpu.matmul %11, %14, %cst_18 {dimension_numbers = #tpu.dot_dimension_numbers<[1], [0], [0], [1], [0, 0, 1, 1], [], []>} : vector<8x64xf32>, vector<64x64xf32>, vector<8x64xf32> -> vector<8x64xf32>
    %c0_19 = arith.constant 0 : index
    %c0_20 = arith.constant 0 : index
    %16 = vector.load %arg10[%c0_19, %c0_20] : memref<1x64xf32, #tpu.memory_space<vmem>>, vector<1x64xf32>
    %17 = vector.broadcast %16 : vector<1x64xf32> to vector<8x64xf32>
    %18 = arith.addf %15, %17 : vector<8x64xf32>
    %cst_21 = arith.constant dense<0.000000e+00> : vector<8x8xf32>
    %19 = tpu.matmul %18, %13, %cst_21 {dimension_numbers = #tpu.dot_dimension_numbers<[1], [1], [0], [0], [0, 0, 1, 0], [], []>} : vector<8x64xf32>, vector<8x64xf32>, vector<8x8xf32> -> vector<8x8xf32>
    %c0_22 = arith.constant 0 : index
    %c0_23 = arith.constant 0 : index
    %20 = memref.load %arg2[%c0_22, %c0_23] : memref<1x1xf32, #tpu.memory_space<smem>>
    %cst_24 = arith.constant 1.000000e+00 : f32
    %21 = arith.subf %cst_24, %20 : f32
    %22 = vector.broadcast %21 : f32 to vector<8x8xf32>
    %23 = arith.mulf %9, %22 : vector<8x8xf32>
    %24 = vector.broadcast %20 : f32 to vector<8x8xf32>
    %25 = arith.mulf %19, %24 : vector<8x8xf32>
    %26 = arith.addf %23, %25 : vector<8x8xf32>
    %c0_25 = arith.constant 0 : index
    %c0_26 = arith.constant 0 : index
    %c0_27 = arith.constant 0 : index
    %27 = vector.load %arg11[%c0_25, %c0_26, %c0_27] : memref<1x8x8xf32, #tpu.memory_space<vmem>>, vector<1x8x8xf32>
    %28 = vector.shape_cast %27 : vector<1x8x8xf32> to vector<8x8xf32>
    %29 = vector.shape_cast %26 : vector<8x8xf32> to vector<1x8x8xf32>
    tpu.vector_store %arg11[%c0_25, %c0_26, %c0_27], %29 {strides = array<i32>} : memref<1x8x8xf32, #tpu.memory_space<vmem>>, vector<1x8x8xf32>,
    return
  }
  func.func @transform_0(%arg0: i32, %arg1: i32) -> (i32, i32) {
    %c0_i32 = arith.constant 0 : i32
    %c0_i32_0 = arith.constant 0 : i32
    %c0_i32_1 = arith.constant 0 : i32
    return %c0_i32, %c0_i32_0 : i32, i32
  }
  func.func @transform_1(%arg0: i32, %arg1: i32) -> (i32, i32, i32) {
    %c0_i32 = arith.constant 0 : i32
    %c0_i32_0 = arith.constant 0 : i32
    return %arg0, %arg1, %c0_i32 : i32, i32, i32
  }
  func.func @transform_2(%arg0: i32, %arg1: i32) -> (i32, i32, i32) {
    %c0_i32 = arith.constant 0 : i32
    %c0_i32_0 = arith.constant 0 : i32
    %c0_i32_1 = arith.constant 0 : i32
    return %arg0, %c0_i32, %c0_i32_0 : i32, i32, i32
  }
  func.func @transform_3(%arg0: i32, %arg1: i32) -> (i32, i32) {
    %c0_i32 = arith.constant 0 : i32
    %c0_i32_0 = arith.constant 0 : i32
    %c0_i32_1 = arith.constant 0 : i32
    return %c0_i32, %c0_i32_0 : i32, i32
  }
  func.func @transform_4(%arg0: i32, %arg1: i32) -> (i32, i32) {
    %c0_i32 = arith.constant 0 : i32
    %c0_i32_0 = arith.constant 0 : i32
    %c0_i32_1 = arith.constant 0 : i32
    return %c0_i32, %c0_i32_0 : i32, i32
  }
  func.func @transform_5(%arg0: i32, %arg1: i32) -> (i32, i32, i32) {
    %c0_i32 = arith.constant 0 : i32
    %c0_i32_0 = arith.constant 0 : i32
    return %arg0, %arg1, %c0_i32 : i32, i32, i32
  }
  func.func @transform_6(%arg0: i32, %arg1: i32) -> (i32, i32, i32) {
    %c0_i32 = arith.constant 0 : i32
    %c0_i32_0 = arith.constant 0 : i32
    %c0_i32_1 = arith.constant 0 : i32
    return %arg0, %c0_i32, %c0_i32_0 : i32, i32, i32
  }
  func.func @transform_7(%arg0: i32, %arg1: i32) -> (i32, i32) {
    %c0_i32 = arith.constant 0 : i32
    %c0_i32_0 = arith.constant 0 : i32
    %c0_i32_1 = arith.constant 0 : i32
    return %c0_i32, %c0_i32_0 : i32, i32
  }
  func.func @transform_8(%arg0: i32, %arg1: i32) -> (i32, i32) {
    %c0_i32 = arith.constant 0 : i32
    %c0_i32_0 = arith.constant 0 : i32
    %c0_i32_1 = arith.constant 0 : i32
    return %c0_i32, %c0_i32_0 : i32, i32
  }
  func.func @transform_9(%arg0: i32, %arg1: i32) -> (i32, i32, i32) {
    %c0_i32 = arith.constant 0 : i32
    %c0_i32_0 = arith.constant 0 : i32
    return %arg0, %arg1, %c0_i32 : i32, i32, i32
  }
}

module attributes {stable_mosaic.version = 11 : i64} {
  func.func @_ens_rel_kernel(%arg0: i32, %arg1: i32, %arg2: memref<1x1xf32, #tpu.memory_space<smem>>, %arg3: memref<1x8x32xf32, #tpu.memory_space<vmem>>, %arg4: memref<1x8x32xf32, #tpu.memory_space<vmem>>, %arg5: memref<8x32x32xf32, #tpu.memory_space<vmem>>, %arg6: memref<8x32xf32, #tpu.memory_space<vmem>>, %arg7: memref<8x32xf32, #tpu.memory_space<vmem>>, %arg8: memref<8x1xf32, #tpu.memory_space<vmem>>, %arg9: memref<1x8x32xf32, #tpu.memory_space<vmem>>, %arg10: memref<1x8x32xf32, #tpu.memory_space<vmem>>, %arg11: memref<8x32x32xf32, #tpu.memory_space<vmem>>, %arg12: memref<8x32xf32, #tpu.memory_space<vmem>>, %arg13: memref<8x32xf32, #tpu.memory_space<vmem>>, %arg14: memref<8x1xf32, #tpu.memory_space<vmem>>, %arg15: memref<1x8x8x8xf32, #tpu.memory_space<vmem>>) attributes {dimension_semantics = [#tpu.dimension_semantics<parallel>, #tpu.dimension_semantics<parallel>], iteration_bounds = array<i64: 2, 1>, scalar_prefetch = 0 : i64, scratch_operands = 0 : i64, tpu.core_type = #tpu.core_type<tc>, window_params = [{transform_indices = @transform_0, window_bounds = array<i64: 1, 1>}, {transform_indices = @transform_1, window_bounds = array<i64: 1, 8, 32>}, {transform_indices = @transform_2, window_bounds = array<i64: 1, 8, 32>}, {pipeline_mode = #tpu.pipeline_mode<synchronous>, transform_indices = @transform_3, window_bounds = array<i64: 8, 32, 32>}, {pipeline_mode = #tpu.pipeline_mode<synchronous>, transform_indices = @transform_4, window_bounds = array<i64: 8, 32>}, {pipeline_mode = #tpu.pipeline_mode<synchronous>, transform_indices = @transform_5, window_bounds = array<i64: 8, 32>}, {pipeline_mode = #tpu.pipeline_mode<synchronous>, transform_indices = @transform_6, window_bounds = array<i64: 8, 1>}, {transform_indices = @transform_7, window_bounds = array<i64: 1, 8, 32>}, {transform_indices = @transform_8, window_bounds = array<i64: 1, 8, 32>}, {pipeline_mode = #tpu.pipeline_mode<synchronous>, transform_indices = @transform_9, window_bounds = array<i64: 8, 32, 32>}, {pipeline_mode = #tpu.pipeline_mode<synchronous>, transform_indices = @transform_10, window_bounds = array<i64: 8, 32>}, {pipeline_mode = #tpu.pipeline_mode<synchronous>, transform_indices = @transform_11, window_bounds = array<i64: 8, 32>}, {pipeline_mode = #tpu.pipeline_mode<synchronous>, transform_indices = @transform_12, window_bounds = array<i64: 8, 1>}, {transform_indices = @transform_13, window_bounds = array<i64: 1, 8, 8, 8>}]} {
    %c0 = arith.constant 0 : index
    %c0_0 = arith.constant 0 : index
    %c0_1 = arith.constant 0 : index
    %0 = vector.load %arg3[%c0, %c0_0, %c0_1] : memref<1x8x32xf32, #tpu.memory_space<vmem>>, vector<1x8x32xf32>
    %1 = vector.shape_cast %0 : vector<1x8x32xf32> to vector<8x32xf32>
    %c0_2 = arith.constant 0 : index
    %c0_3 = arith.constant 0 : index
    %c0_4 = arith.constant 0 : index
    %2 = vector.load %arg4[%c0_2, %c0_3, %c0_4] : memref<1x8x32xf32, #tpu.memory_space<vmem>>, vector<1x8x32xf32>
    %3 = vector.shape_cast %2 : vector<1x8x32xf32> to vector<8x32xf32>
    %c0_5 = arith.constant 0 : index
    %c0_6 = arith.constant 0 : index
    %c0_7 = arith.constant 0 : index
    %4 = vector.load %arg5[%c0_5, %c0_6, %c0_7] : memref<8x32x32xf32, #tpu.memory_space<vmem>>, vector<8x32x32xf32>
    %5 = vector.shape_cast %1 : vector<8x32xf32> to vector<1x8x32xf32>
    %6 = vector.shape_cast %5 : vector<1x8x32xf32> to vector<1x8x32xf32>
    %7 = vector.broadcast %6 : vector<1x8x32xf32> to vector<8x8x32xf32>
    %8 = vector.shape_cast %3 : vector<8x32xf32> to vector<1x8x32xf32>
    %9 = vector.shape_cast %8 : vector<1x8x32xf32> to vector<1x8x32xf32>
    %10 = vector.broadcast %9 : vector<1x8x32xf32> to vector<8x8x32xf32>
    "tpu.trace_start"() <{level = 10 : i32, message = "rik,rkm->rim"}> : () -> ()
    %cst = arith.constant dense<0.000000e+00> : vector<8x8x32xf32>
    %11 = tpu.matmul %7, %4, %cst {dimension_numbers = #tpu.dot_dimension_numbers<[2], [1], [1], [2], [0, 0, 0, 1, 1, 2], [0], [0]>} : vector<8x8x32xf32>, vector<8x32x32xf32>, vector<8x8x32xf32> -> vector<8x8x32xf32>
    "tpu.trace_stop"() : () -> ()
    "tpu.trace_start"() <{level = 10 : i32, message = "rim,rjm->rij"}> : () -> ()
    %cst_8 = arith.constant dense<0.000000e+00> : vector<8x8x8xf32>
    %12 = tpu.matmul %11, %10, %cst_8 {dimension_numbers = #tpu.dot_dimension_numbers<[2], [2], [1], [1], [0, 0, 0, 1, 1, 1], [0], [0]>} : vector<8x8x32xf32>, vector<8x8x32xf32>, vector<8x8x8xf32> -> vector<8x8x8xf32>
    "tpu.trace_stop"() : () -> ()
    %c0_9 = arith.constant 0 : index
    %c0_10 = arith.constant 0 : index
    %13 = vector.load %arg6[%c0_9, %c0_10] : memref<8x32xf32, #tpu.memory_space<vmem>>, vector<8x32xf32>
    %cst_11 = arith.constant dense<0.000000e+00> : vector<8x8xf32>
    %14 = tpu.matmul %13, %3, %cst_11 {dimension_numbers = #tpu.dot_dimension_numbers<[1], [1], [0], [0], [0, 0, 1, 0], [], []>} : vector<8x32xf32>, vector<8x32xf32>, vector<8x8xf32> -> vector<8x8xf32>
    %c0_12 = arith.constant 0 : index
    %c0_13 = arith.constant 0 : index
    %15 = vector.load %arg7[%c0_12, %c0_13] : memref<8x32xf32, #tpu.memory_space<vmem>>, vector<8x32xf32>
    %cst_14 = arith.constant dense<0.000000e+00> : vector<8x8xf32>
    %16 = tpu.matmul %15, %1, %cst_14 {dimension_numbers = #tpu.dot_dimension_numbers<[1], [1], [0], [0], [0, 0, 1, 0], [], []>} : vector<8x32xf32>, vector<8x32xf32>, vector<8x8xf32> -> vector<8x8xf32>
    %c0_15 = arith.constant 0 : index
    %c0_16 = arith.constant 0 : index
    %17 = vector.load %arg8[%c0_15, %c0_16] : memref<8x1xf32, #tpu.memory_space<vmem>>, vector<8x1xf32>
    %18 = vector.broadcast %17 : vector<8x1xf32> to vector<8x8xf32>
    %19 = arith.addf %16, %18 : vector<8x8xf32>
    %20 = vector.shape_cast %14 : vector<8x8xf32> to vector<8x1x8xf32>
    %21 = vector.broadcast %20 : vector<8x1x8xf32> to vector<8x8x8xf32>
    %22 = arith.addf %12, %21 : vector<8x8x8xf32>
    %23 = vector.shape_cast %19 : vector<8x8xf32> to vector<8x8x1xf32>
    %24 = vector.broadcast %23 : vector<8x8x1xf32> to vector<8x8x8xf32>
    %25 = arith.addf %22, %24 : vector<8x8x8xf32>
    %c0_17 = arith.constant 0 : index
    %c0_18 = arith.constant 0 : index
    %c0_19 = arith.constant 0 : index
    %26 = vector.load %arg9[%c0_17, %c0_18, %c0_19] : memref<1x8x32xf32, #tpu.memory_space<vmem>>, vector<1x8x32xf32>
    %27 = vector.shape_cast %26 : vector<1x8x32xf32> to vector<8x32xf32>
    %c0_20 = arith.constant 0 : index
    %c0_21 = arith.constant 0 : index
    %c0_22 = arith.constant 0 : index
    %28 = vector.load %arg10[%c0_20, %c0_21, %c0_22] : memref<1x8x32xf32, #tpu.memory_space<vmem>>, vector<1x8x32xf32>
    %29 = vector.shape_cast %28 : vector<1x8x32xf32> to vector<8x32xf32>
    %c0_23 = arith.constant 0 : index
    %c0_24 = arith.constant 0 : index
    %c0_25 = arith.constant 0 : index
    %30 = vector.load %arg11[%c0_23, %c0_24, %c0_25] : memref<8x32x32xf32, #tpu.memory_space<vmem>>, vector<8x32x32xf32>
    %31 = vector.shape_cast %27 : vector<8x32xf32> to vector<1x8x32xf32>
    %32 = vector.shape_cast %31 : vector<1x8x32xf32> to vector<1x8x32xf32>
    %33 = vector.broadcast %32 : vector<1x8x32xf32> to vector<8x8x32xf32>
    %34 = vector.shape_cast %29 : vector<8x32xf32> to vector<1x8x32xf32>
    %35 = vector.shape_cast %34 : vector<1x8x32xf32> to vector<1x8x32xf32>
    %36 = vector.broadcast %35 : vector<1x8x32xf32> to vector<8x8x32xf32>
    "tpu.trace_start"() <{level = 10 : i32, message = "rik,rkm->rim"}> : () -> ()
    %cst_26 = arith.constant dense<0.000000e+00> : vector<8x8x32xf32>
    %37 = tpu.matmul %33, %30, %cst_26 {dimension_numbers = #tpu.dot_dimension_numbers<[2], [1], [1], [2], [0, 0, 0, 1, 1, 2], [0], [0]>} : vector<8x8x32xf32>, vector<8x32x32xf32>, vector<8x8x32xf32> -> vector<8x8x32xf32>
    "tpu.trace_stop"() : () -> ()
    "tpu.trace_start"() <{level = 10 : i32, message = "rim,rjm->rij"}> : () -> ()
    %cst_27 = arith.constant dense<0.000000e+00> : vector<8x8x8xf32>
    %38 = tpu.matmul %37, %36, %cst_27 {dimension_numbers = #tpu.dot_dimension_numbers<[2], [2], [1], [1], [0, 0, 0, 1, 1, 1], [0], [0]>} : vector<8x8x32xf32>, vector<8x8x32xf32>, vector<8x8x8xf32> -> vector<8x8x8xf32>
    "tpu.trace_stop"() : () -> ()
    %c0_28 = arith.constant 0 : index
    %c0_29 = arith.constant 0 : index
    %39 = vector.load %arg12[%c0_28, %c0_29] : memref<8x32xf32, #tpu.memory_space<vmem>>, vector<8x32xf32>
    %cst_30 = arith.constant dense<0.000000e+00> : vector<8x8xf32>
    %40 = tpu.matmul %39, %29, %cst_30 {dimension_numbers = #tpu.dot_dimension_numbers<[1], [1], [0], [0], [0, 0, 1, 0], [], []>} : vector<8x32xf32>, vector<8x32xf32>, vector<8x8xf32> -> vector<8x8xf32>
    %c0_31 = arith.constant 0 : index
    %c0_32 = arith.constant 0 : index
    %41 = vector.load %arg13[%c0_31, %c0_32] : memref<8x32xf32, #tpu.memory_space<vmem>>, vector<8x32xf32>
    %cst_33 = arith.constant dense<0.000000e+00> : vector<8x8xf32>
    %42 = tpu.matmul %41, %27, %cst_33 {dimension_numbers = #tpu.dot_dimension_numbers<[1], [1], [0], [0], [0, 0, 1, 0], [], []>} : vector<8x32xf32>, vector<8x32xf32>, vector<8x8xf32> -> vector<8x8xf32>
    %c0_34 = arith.constant 0 : index
    %c0_35 = arith.constant 0 : index
    %43 = vector.load %arg14[%c0_34, %c0_35] : memref<8x1xf32, #tpu.memory_space<vmem>>, vector<8x1xf32>
    %44 = vector.broadcast %43 : vector<8x1xf32> to vector<8x8xf32>
    %45 = arith.addf %42, %44 : vector<8x8xf32>
    %46 = vector.shape_cast %40 : vector<8x8xf32> to vector<8x1x8xf32>
    %47 = vector.broadcast %46 : vector<8x1x8xf32> to vector<8x8x8xf32>
    %48 = arith.addf %38, %47 : vector<8x8x8xf32>
    %49 = vector.shape_cast %45 : vector<8x8xf32> to vector<8x8x1xf32>
    %50 = vector.broadcast %49 : vector<8x8x1xf32> to vector<8x8x8xf32>
    %51 = arith.addf %48, %50 : vector<8x8x8xf32>
    %c0_36 = arith.constant 0 : index
    %c0_37 = arith.constant 0 : index
    %52 = memref.load %arg2[%c0_36, %c0_37] : memref<1x1xf32, #tpu.memory_space<smem>>
    %cst_38 = arith.constant 1.000000e+00 : f32
    %53 = arith.subf %cst_38, %52 : f32
    %54 = vector.broadcast %53 : f32 to vector<8x8x8xf32>
    %55 = arith.mulf %25, %54 : vector<8x8x8xf32>
    %56 = vector.broadcast %52 : f32 to vector<8x8x8xf32>
    %57 = arith.mulf %51, %56 : vector<8x8x8xf32>
    %58 = arith.addf %55, %57 : vector<8x8x8xf32>
    %c0_39 = arith.constant 0 : index
    %c0_40 = arith.constant 0 : index
    %c0_41 = arith.constant 0 : index
    %c0_42 = arith.constant 0 : index
    %59 = vector.load %arg15[%c0_39, %c0_40, %c0_41, %c0_42] : memref<1x8x8x8xf32, #tpu.memory_space<vmem>>, vector<1x8x8x8xf32>
    %60 = vector.shape_cast %59 : vector<1x8x8x8xf32> to vector<8x8x8xf32>
    %61 = vector.shape_cast %58 : vector<8x8x8xf32> to vector<1x8x8x8xf32>
    tpu.vector_store %arg15[%c0_39, %c0_40, %c0_41, %c0_42], %61 {strides = array<i32>} : memref<1x8x8x8xf32, #tpu.memory_space<vmem>>, vector<1x8x8x8xf32>,
    return
  }
  func.func @transform_0(%arg0: i32, %arg1: i32) -> (i32, i32) {
    %c0_i32 = arith.constant 0 : i32
    %c0_i32_0 = arith.constant 0 : i32
    %c0_i32_1 = arith.constant 0 : i32
    return %c0_i32, %c0_i32_0 : i32, i32
  }
  func.func @transform_1(%arg0: i32, %arg1: i32) -> (i32, i32, i32) {
    %c0_i32 = arith.constant 0 : i32
    %c0_i32_0 = arith.constant 0 : i32
    return %arg0, %arg1, %c0_i32 : i32, i32, i32
  }
  func.func @transform_2(%arg0: i32, %arg1: i32) -> (i32, i32, i32) {
    %c0_i32 = arith.constant 0 : i32
    %c0_i32_0 = arith.constant 0 : i32
    %c0_i32_1 = arith.constant 0 : i32
    return %arg0, %c0_i32, %c0_i32_0 : i32, i32, i32
  }
  func.func @transform_3(%arg0: i32, %arg1: i32) -> (i32, i32, i32) {
    %c0_i32 = arith.constant 0 : i32
    %c0_i32_0 = arith.constant 0 : i32
    %c0_i32_1 = arith.constant 0 : i32
    %c0_i32_2 = arith.constant 0 : i32
    return %c0_i32, %c0_i32_0, %c0_i32_1 : i32, i32, i32
  }
  func.func @transform_4(%arg0: i32, %arg1: i32) -> (i32, i32) {
    %c0_i32 = arith.constant 0 : i32
    %c0_i32_0 = arith.constant 0 : i32
    %c0_i32_1 = arith.constant 0 : i32
    return %c0_i32, %c0_i32_0 : i32, i32
  }
  func.func @transform_5(%arg0: i32, %arg1: i32) -> (i32, i32) {
    %c0_i32 = arith.constant 0 : i32
    %c0_i32_0 = arith.constant 0 : i32
    %c0_i32_1 = arith.constant 0 : i32
    return %c0_i32, %c0_i32_0 : i32, i32
  }
  func.func @transform_6(%arg0: i32, %arg1: i32) -> (i32, i32) {
    %c0_i32 = arith.constant 0 : i32
    %c0_i32_0 = arith.constant 0 : i32
    %c0_i32_1 = arith.constant 0 : i32
    return %c0_i32, %c0_i32_0 : i32, i32
  }
  func.func @transform_7(%arg0: i32, %arg1: i32) -> (i32, i32, i32) {
    %c0_i32 = arith.constant 0 : i32
    %c0_i32_0 = arith.constant 0 : i32
    return %arg0, %arg1, %c0_i32 : i32, i32, i32
  }
  func.func @transform_8(%arg0: i32, %arg1: i32) -> (i32, i32, i32) {
    %c0_i32 = arith.constant 0 : i32
    %c0_i32_0 = arith.constant 0 : i32
    %c0_i32_1 = arith.constant 0 : i32
    return %arg0, %c0_i32, %c0_i32_0 : i32, i32, i32
  }
  func.func @transform_9(%arg0: i32, %arg1: i32) -> (i32, i32, i32) {
    %c0_i32 = arith.constant 0 : i32
    %c0_i32_0 = arith.constant 0 : i32
    %c0_i32_1 = arith.constant 0 : i32
    %c0_i32_2 = arith.constant 0 : i32
    return %c0_i32, %c0_i32_0, %c0_i32_1 : i32, i32, i32
  }
  func.func @transform_10(%arg0: i32, %arg1: i32) -> (i32, i32) {
    %c0_i32 = arith.constant 0 : i32
    %c0_i32_0 = arith.constant 0 : i32
    %c0_i32_1 = arith.constant 0 : i32
    return %c0_i32, %c0_i32_0 : i32, i32
  }
  func.func @transform_11(%arg0: i32, %arg1: i32) -> (i32, i32) {
    %c0_i32 = arith.constant 0 : i32
    %c0_i32_0 = arith.constant 0 : i32
    %c0_i32_1 = arith.constant 0 : i32
    return %c0_i32, %c0_i32_0 : i32, i32
  }
  func.func @transform_12(%arg0: i32, %arg1: i32) -> (i32, i32) {
    %c0_i32 = arith.constant 0 : i32
    %c0_i32_0 = arith.constant 0 : i32
    %c0_i32_1 = arith.constant 0 : i32
    return %c0_i32, %c0_i32_0 : i32, i32
  }
  func.func @transform_13(%arg0: i32, %arg1: i32) -> (i32, i32, i32, i32) {
    %c0_i32 = arith.constant 0 : i32
    %c0_i32_0 = arith.constant 0 : i32
    %c0_i32_1 = arith.constant 0 : i32
    return %arg0, %c0_i32, %arg1, %c0_i32_0 : i32, i32, i32, i32
  }
}

</mosaic_0001>

<bundles_post_ra>
// kernel: _lambda_.5
= control target key start
LH: loop header
LB: loop body
LE: loop exit
PB: predicated region body
PF: predicated region fallthrough
CT: control target
= control target key end

     0   :  { %s653_s18 = smov 0   ;;  %s655_s19 = smov 0   ;;  %s758_s0 = inlined_call_operand.vmem [shape: f32[2,8,32], index: 0, kind: input, shape index: {}]   ;;  %s759_s1 = inlined_call_operand.vmem [shape: f32[32,64], index: 1, kind: input, shape index: {}]   ;;  %s760_s2 = inlined_call_operand.vmem [shape: f32[1,64], index: 2, kind: input, shape index: {}]   ;;  %s761_s3 = inlined_call_operand.vmem [shape: f32[64,192], index: 3, kind: input, shape index: {}]   ;;  %s762_s4 = inlined_call_operand.vmem [shape: f32[1,192], index: 4, kind: input, shape index: {}]   ;;  %s763_s5 = inlined_call_operand.vmem [shape: f32[2,8,192], index: 5, kind: output, shape index: {}]  }
   0x1   :  { %s657_s20 = smov 0  }
   0x2 LB: > { %s27_s21 = sadd.s32 1, %s615_s19  ;;  %p543_p0 = scmp.ge.s32.totalorder %s619_s20, 1  ;;  %s619_s20 = sphi %s657_s20, %s15_s20   ;;  %s615_s19 = sphi %s655_s19, %s765_s19   ;;  %s611_s18 = sphi %s653_s18, %s764_s18  }
   0x3   : > { %p29_p1 = scmp.ge.s32.totalorder %s27_s21, 2  ;;  %p205_p2 = scmp.lt.s32.totalorder %s619_s20, 3 }
   0x5   : > { %s767_s21 = smov (%p29_p1, %s27_s21), 0  ;;  %p206_p3 = pnand %p543_p0, %p205_p2 }
   0x6   : > { %p239_p4 = scmp.lt.s32.totalorder (!%p206_p3), %s611_s18, 1 }
   0x7   : > { %209 = sbr.rel (%p206_p3) target bundleno = 431 (0x1af), region = 40 }
   0xc   : > { %v259_v0 = vld [vmem:[%s759_s1 + $0x18] sm:$0xff]  ;;  %v621_v1 = vmov 0.0   ;;  %v258_v2 = vld [vmem:[%s759_s1 + $0x10] sm:$0xff]  ;;  %vm622_vm0 = vmmov 0   ;;  %s769_s18 = smov (!%p239_p4, %s611_s18), 1  ;;  %v257_v3 = vld [vmem:[%s759_s1 + $0x8] sm:$0xff]  ;;  %v360_v27 = vlaneseq }
   0xd   : > { %558 = vmatprep.subr.mxu0 %v621_v1  ;;  %566 = vmatprep.mubr.msk.f32.mxu0 %vm622_vm0, %v621_v1  ;;  %s544_s28 = sshll.u32 %s769_s18, 3  ;;  %v256_v4 = vld [vmem:[%s759_s1] sm:$0xff]  ;;  %vm267_vm1 = vcmask 261120   ;;  %v357_v6 = vld [vmem:[%s761_s3 + $0x78] sm:$0xff]  ;;  %v356_v7 = vld [vmem:[%s761_s3 + $0x70] sm:$0xff]  ;;  %vm370_vm2 = vcmask 523264  }
   0xe   : > { %559 = vmatpush3.msra.mxu0 %v259_v0  ;;  %438 = vmatprep.mubr.f32.mxu1 %v621_v1  ;;  %s245_s8 = scalar_lea.vmem %s758_s0, %s544_s28  ;;  %v355_v8 = vld [vmem:[%s761_s3 + $0x68] sm:$0xff]  ;;  %v354_v9 = vld [vmem:[%s761_s3 + $0x60] sm:$0xff]  ;;  %v353_v10 = vld [vmem:[%s761_s3 + $0x58] sm:$0xff]  ;;  %v361_v28 = vshrl.u32 %v360_v27, 7  ;;  %s552_s28 = sshll.u32 %s769_s18, 4 }
   0xf   : > { %560 = vmatprep.subr.mxu0 %v621_v1  ;;  %v255_v5 = vld [vmem:[%s245_s8] sm:$0xff]  ;;  %390 = vmatprep.subr.mxu1 %v357_v6  ;;  %v352_v11 = vld [vmem:[%s761_s3 + $0x50] sm:$0xff]  ;;  %v351_v12 = vld [vmem:[%s761_s3 + $0x48] sm:$0xff]  ;;  %s254_s6 = scalar_lea.vmem %s763_s5, %s552_s28 }
  0x10   : > { %561 = vmatpush3.msra.mxu0 %v258_v2  ;;  %391 = vmatpush1.msra.mxu1 %v356_v7  ;;  %v350_v13 = vld [vmem:[%s761_s3 + $0x40] sm:$0xff]  ;;  %v349_v14 = vld [vmem:[%s761_s3 + $0x38] sm:$0xff]  ;;  %v348_v15 = vld [vmem:[%s761_s3 + $0x30] sm:$0xff]  ;;  %v362_v29 = vsub.s32 0, %v361_v28  ;;  %v366_v31 = vsub.s32 1, %v361_v28 }
  0x11   : > { %562 = vmatprep.subr.mxu0 %v621_v1  ;;  %392 = vmatprep.subr.mxu1 %v355_v8  ;;  %v347_v16 = vld [vmem:[%s761_s3 + $0x28] sm:$0xff]  ;;  %v346_v17 = vld [vmem:[%s761_s3 + $0x20] sm:$0xff]  ;;  %v345_v18 = vld [vmem:[%s761_s3 + $0x18] sm:$0xff] }
  0x12   : > { %563 = vmatpush3.msra.mxu0 %v257_v3  ;;  %393 = vmatpush1.msra.mxu1 %v354_v9  ;;  %v344_v19 = vld [vmem:[%s761_s3 + $0x10] sm:$0xff]  ;;  %v343_v20 = vld [vmem:[%s761_s3 + $0x8] sm:$0xff]  ;;  %v342_v21 = vld [vmem:[%s761_s3] sm:$0xff] }
  0x13   : > { %564 = vmatprep.subr.mxu0 %v621_v1  ;;  %394 = vmatprep.subr.mxu1 %v353_v10  ;;  %v547_v22 = vld [vmem:[%s760_s2] ss:$0 sm:$0xff] }
  0x14   : > { %565 = vmatpush3.msra.mxu0 %v256_v4  ;;  %395 = vmatpush1.msra.mxu1 %v352_v11  ;;  %v358_v30 = vld [vmem:[%s762_s4] sm:$0x3] }
  0x15   : > { %567 = vmatmul.mubr.msk.f32.vlgmr.msra.gmra.mxu0 %vm267_vm1, %v255_v5  ;;  %396 = vmatprep.subr.mxu1 %v351_v12  ;;  %v363_v32 = vrot.slane %v358_v30, %v362_v29  ;;  %v367_v33 = vrot.slane %v358_v30, %v366_v31 }
  0x16   : > { %397 = vmatpush1.msra.mxu1 %v350_v13 }
  0x17   : > { %398 = vmatprep.subr.mxu1 %v349_v14 }
  0x18   : > { %399 = vmatpush1.msra.mxu1 %v348_v15 }
  0x19   : > { %400 = vmatprep.subr.mxu1 %v347_v16 }
  0x1a   : > { %401 = vmatpush1.msra.mxu1 %v346_v17 }
  0x1b   : > { %402 = vmatprep.subr.mxu1 %v345_v18 }
  0x1c   : > { %403 = vmatpush1.msra.mxu1 %v344_v19 }
  0x1d   : > { %404 = vmatprep.subr.mxu1 %v343_v20 }
  0x1e   : > { %405 = vmatpush1.msra.mxu1 %v342_v21 }
  0xd5   : > { %v337_v23 = vpop.f32.mrf.mxu0 }
  0xd6   : > { %v338_v24 = vadd.f32 %v547_v22, %v337_v23 }
  0xd7   : > { %v568_v25 = vpop.f32.mrf.mxu0 }
  0xd8   : > { %595 = vtanh.f32 %v338_v24 }
  0xe5   : > { %v596_v26 = vpop.eup %595 }
  0xe6   : > { %549 = vmatmul.mubr.msk.f32.vlgmr.msra.gmra.mxu1 %vm370_vm2, %v596_v26 }
 0x1a6   : > { %v440_v34 = vpop.f32.mrf.mxu1 }
 0x1a7   : > { %v441_v35 = vadd.f32 %v440_v34, %v363_v32 }
 0x1a8   : > { %v442_v36 = vpop.f32.mrf.mxu1 }
 0x1a9   : > { %vm445_vm3 = vcmp.gt.f32.partialorder %v441_v35, 0.0  ;;  %v447_v37 = vmul.f32 0.1, %v441_v35  ;;  %v443_v38 = vadd.f32 %v442_v36, %v367_v33 }
 0x1ab   : > { %v449_v39 = vsel %vm445_vm3, %v441_v35, %v447_v37  ;;  %vm446_vm4 = vcmp.gt.f32.partialorder %v443_v38, 0.0  ;;  %v448_v40 = vmul.f32 0.1, %v443_v38 }
 0x1ac   : > { %451 = vst [vmem:[%s254_s6] sm:$0xff] %v449_v39 }
 0x1ad   : > { %v450_v41 = vsel %vm446_vm4, %v443_v38, %v448_v40 }
 0x1ae   : > { %452 = vst.msk [vmem:[%s254_s6 + $0x8] sm:$0xff] %vm370_vm2, %v450_v41 }
 0x1af PF: > { %s15_s20 = sadd.s32 1, %s619_s20   ;;  %s764_s18 = smov %s615_s19 }
 0x1b0   : > { %p12_p5 = scmp.ge.s32.totalorder %s15_s20, 4   ;;  %s765_s19 = smov %s767_s21 }
 0x1b2   :  { %14 = sbr.rel (!%p12_p5) target bundleno = 2 (0x2), region = 70 }

// kernel: _lambda_.4
= control target key start
LH: loop header
LB: loop body
LE: loop exit
PB: predicated region body
PF: predicated region fallthrough
CT: control target
= control target key end

     0   :  { %s685_s18 = smov 0   ;;  %s687_s19 = smov 0   ;;  %s818_s0 = inlined_call_operand.vmem [shape: f32[2,8,96], index: 0, kind: input, shape index: {}]   ;;  %s819_s1 = inlined_call_operand.vmem [shape: f32[96,64], index: 1, kind: input, shape index: {}]   ;;  %s820_s2 = inlined_call_operand.vmem [shape: f32[1,64], index: 2, kind: input, shape index: {}]   ;;  %s821_s3 = inlined_call_operand.vmem [shape: f32[64,192], index: 3, kind: input, shape index: {}]   ;;  %s822_s4 = inlined_call_operand.vmem [shape: f32[1,192], index: 4, kind: input, shape index: {}]   ;;  %s823_s5 = inlined_call_operand.vmem [shape: f32[2,8,192], index: 5, kind: output, shape index: {}]  }
   0x1   :  { %s689_s20 = smov 0  }
   0x2 LB: > { %s27_s21 = sadd.s32 1, %s647_s19  ;;  %p551_p0 = scmp.ge.s32.totalorder %s651_s20, 1  ;;  %s651_s20 = sphi %s689_s20, %s15_s20   ;;  %s647_s19 = sphi %s687_s19, %s825_s19   ;;  %s643_s18 = sphi %s685_s18, %s824_s18  }
   0x3   : > { %p29_p1 = scmp.ge.s32.totalorder %s27_s21, 2  ;;  %p205_p2 = scmp.lt.s32.totalorder %s651_s20, 3 }
   0x5   : > { %s827_s21 = smov (%p29_p1, %s27_s21), 0  ;;  %p206_p3 = pnand %p551_p0, %p205_p2 }
   0x6   : > { %p239_p4 = scmp.lt.s32.totalorder (!%p206_p3), %s643_s18, 1 }
   0x7   : > { %209 = sbr.rel (%p206_p3) target bundleno = 447 (0x1bf), region = 40 }
   0xc   : > { %v267_v0 = vld [vmem:[%s819_s1 + $0x58] sm:$0xff]  ;;  %v653_v1 = vmov 0.0   ;;  %v266_v2 = vld [vmem:[%s819_s1 + $0x50] sm:$0xff]  ;;  %vm654_vm0 = vmmov 0   ;;  %v265_v3 = vld [vmem:[%s819_s1 + $0x48] sm:$0xff]  ;;  %s829_s18 = smov (!%p239_p4, %s643_s18), 1  ;;  %v368_v35 = vlaneseq }
   0xd   : > { %574 = vmatprep.subr.mxu0 %v653_v1  ;;  %598 = vmatprep.mubr.msk.f32.mxu0 %vm654_vm0, %v653_v1  ;;  %v264_v4 = vld [vmem:[%s819_s1 + $0x40] sm:$0xff]  ;;  %v263_v5 = vld [vmem:[%s819_s1 + $0x38] sm:$0xff]  ;;  %v262_v6 = vld [vmem:[%s819_s1 + $0x30] sm:$0xff]  ;;  %s552_s15 = sshll.u32 %s829_s18, 3  ;;  %vm275_vm1 = vcmask 785408   ;;  %vm378_vm2 = vcmask 523264  }
   0xe   : > { %575 = vmatpush3.msra.mxu0 %v267_v0  ;;  %446 = vmatprep.mubr.f32.mxu1 %v653_v1  ;;  %v261_v7 = vld [vmem:[%s819_s1 + $0x28] sm:$0xff]  ;;  %v260_v8 = vld [vmem:[%s819_s1 + $0x20] sm:$0xff]  ;;  %v259_v9 = vld [vmem:[%s819_s1 + $0x18] sm:$0xff]  ;;  %s245_s26 = scalar_lea.vmem %s818_s0, %s552_s15  ;;  %v369_v36 = vshrl.u32 %v368_v35, 7  ;;  %s560_s23 = sshll.u32 %s829_s18, 4 }
   0xf   : > { %576 = vmatprep.subr.mxu0 %v653_v1  ;;  %v258_v10 = vld [vmem:[%s819_s1 + $0x10] sm:$0xff]  ;;  %v257_v11 = vld [vmem:[%s819_s1 + $0x8] sm:$0xff]  ;;  %v256_v12 = vld [vmem:[%s819_s1] sm:$0xff] }
  0x10   : > { %577 = vmatpush3.msra.mxu0 %v266_v2  ;;  %v255_v13 = vld [vmem:[%s245_s26] sm:$0xff]  ;;  %v365_v14 = vld [vmem:[%s821_s3 + $0x78] sm:$0xff]  ;;  %v364_v15 = vld [vmem:[%s821_s3 + $0x70] sm:$0xff]  ;;  %v370_v37 = vsub.s32 0, %v369_v36  ;;  %v374_v39 = vsub.s32 1, %v369_v36  ;;  %s254_s26 = scalar_lea.vmem %s823_s5, %s560_s23 }
  0x11   : > { %578 = vmatprep.subr.mxu0 %v653_v1  ;;  %398 = vmatprep.subr.mxu1 %v365_v14  ;;  %v363_v16 = vld [vmem:[%s821_s3 + $0x68] sm:$0xff]  ;;  %v362_v17 = vld [vmem:[%s821_s3 + $0x60] sm:$0xff]  ;;  %v361_v18 = vld [vmem:[%s821_s3 + $0x58] sm:$0xff] }
  0x12   : > { %579 = vmatpush3.msra.mxu0 %v265_v3  ;;  %399 = vmatpush1.msra.mxu1 %v364_v15  ;;  %v360_v19 = vld [vmem:[%s821_s3 + $0x50] sm:$0xff]  ;;  %v359_v20 = vld [vmem:[%s821_s3 + $0x48] sm:$0xff]  ;;  %v358_v21 = vld [vmem:[%s821_s3 + $0x40] sm:$0xff] }
  0x13   : > { %580 = vmatprep.subr.mxu0 %v653_v1  ;;  %400 = vmatprep.subr.mxu1 %v363_v16  ;;  %v357_v22 = vld [vmem:[%s821_s3 + $0x38] sm:$0xff]  ;;  %v356_v23 = vld [vmem:[%s821_s3 + $0x30] sm:$0xff]  ;;  %v355_v24 = vld [vmem:[%s821_s3 + $0x28] sm:$0xff] }
  0x14   : > { %581 = vmatpush3.msra.mxu0 %v264_v4  ;;  %401 = vmatpush1.msra.mxu1 %v362_v17  ;;  %v354_v25 = vld [vmem:[%s821_s3 + $0x20] sm:$0xff]  ;;  %v353_v26 = vld [vmem:[%s821_s3 + $0x18] sm:$0xff]  ;;  %v352_v27 = vld [vmem:[%s821_s3 + $0x10] sm:$0xff] }
  0x15   : > { %582 = vmatprep.subr.mxu0 %v653_v1  ;;  %402 = vmatprep.subr.mxu1 %v361_v18  ;;  %v351_v28 = vld [vmem:[%s821_s3 + $0x8] sm:$0xff]  ;;  %v350_v29 = vld [vmem:[%s821_s3] sm:$0xff] }
  0x16   : > { %583 = vmatpush3.msra.mxu0 %v263_v5  ;;  %403 = vmatpush1.msra.mxu1 %v360_v19  ;;  %v555_v30 = vld [vmem:[%s820_s2] ss:$0 sm:$0xff] }
  0x17   : > { %584 = vmatprep.subr.mxu0 %v653_v1  ;;  %404 = vmatprep.subr.mxu1 %v359_v20  ;;  %v366_v38 = vld [vmem:[%s822_s4] sm:$0x3] }
  0x18   : > { %585 = vmatpush3.msra.mxu0 %v262_v6  ;;  %405 = vmatpush1.msra.mxu1 %v358_v21  ;;  %v371_v40 = vrot.slane %v366_v38, %v370_v37  ;;  %v375_v41 = vrot.slane %v366_v38, %v374_v39 }
  0x19   : > { %586 = vmatprep.subr.mxu0 %v653_v1  ;;  %406 = vmatprep.subr.mxu1 %v357_v22 }
  0x1a   : > { %587 = vmatpush3.msra.mxu0 %v261_v7  ;;  %407 = vmatpush1.msra.mxu1 %v356_v23 }
  0x1b   : > { %588 = vmatprep.subr.mxu0 %v653_v1  ;;  %408 = vmatprep.subr.mxu1 %v355_v24 }
  0x1c   : > { %589 = vmatpush3.msra.mxu0 %v260_v8  ;;  %409 = vmatpush1.msra.mxu1 %v354_v25 }
  0x1d   : > { %590 = vmatprep.subr.mxu0 %v653_v1  ;;  %410 = vmatprep.subr.mxu1 %v353_v26 }
  0x1e   : > { %591 = vmatpush3.msra.mxu0 %v259_v9  ;;  %411 = vmatpush1.msra.mxu1 %v352_v27 }
  0x1f   : > { %592 = vmatprep.subr.mxu0 %v653_v1  ;;  %412 = vmatprep.subr.mxu1 %v351_v28 }
  0x20   : > { %593 = vmatpush3.msra.mxu0 %v258_v10  ;;  %413 = vmatpush1.msra.mxu1 %v350_v29 }
  0x21   : > { %594 = vmatprep.subr.mxu0 %v653_v1 }
  0x22   : > { %595 = vmatpush3.msra.mxu0 %v257_v11 }
  0x23   : > { %596 = vmatprep.subr.mxu0 %v653_v1 }
  0x24   : > { %597 = vmatpush3.msra.mxu0 %v256_v12 }
  0x25   : > { %599 = vmatmul.mubr.msk.f32.vlgmr.msra.gmra.mxu0 %vm275_vm1, %v255_v13 }
  0xe5   : > { %v345_v31 = vpop.f32.mrf.mxu0 }
  0xe6   : > { %v346_v32 = vadd.f32 %v555_v30, %v345_v31 }
  0xe7   : > { %v600_v33 = vpop.f32.mrf.mxu0 }
  0xe8   : > { %627 = vtanh.f32 %v346_v32 }
  0xf5   : > { %v628_v34 = vpop.eup %627 }
  0xf6   : > { %557 = vmatmul.mubr.msk.f32.vlgmr.msra.gmra.mxu1 %vm378_vm2, %v628_v34 }
 0x1b6   : > { %v448_v42 = vpop.f32.mrf.mxu1 }
 0x1b7   : > { %v449_v43 = vadd.f32 %v448_v42, %v371_v40 }
 0x1b8   : > { %v450_v44 = vpop.f32.mrf.mxu1 }
 0x1b9   : > { %vm453_vm3 = vcmp.gt.f32.partialorder %v449_v43, 0.0  ;;  %v455_v45 = vmul.f32 0.1, %v449_v43  ;;  %v451_v46 = vadd.f32 %v450_v44, %v375_v41 }
 0x1bb   : > { %v457_v47 = vsel %vm453_vm3, %v449_v43, %v455_v45  ;;  %vm454_vm4 = vcmp.gt.f32.partialorder %v451_v46, 0.0  ;;  %v456_v48 = vmul.f32 0.1, %v451_v46 }
 0x1bc   : > { %459 = vst [vmem:[%s254_s26] sm:$0xff] %v457_v47 }
 0x1bd   : > { %v458_v49 = vsel %vm454_vm4, %v451_v46, %v456_v48 }
 0x1be   : > { %460 = vst.msk [vmem:[%s254_s26 + $0x8] sm:$0xff] %vm378_vm2, %v458_v49 }
 0x1bf PF: > { %s15_s20 = sadd.s32 1, %s651_s20   ;;  %s824_s18 = smov %s647_s19 }
 0x1c0   : > { %p12_p5 = scmp.ge.s32.totalorder %s15_s20, 4   ;;  %s825_s19 = smov %s827_s21 }
 0x1c2   :  { %14 = sbr.rel (!%p12_p5) target bundleno = 2 (0x2), region = 70 }

// kernel: _lambda_.6
= control target key start
LH: loop header
LB: loop body
LE: loop exit
PB: predicated region body
PF: predicated region fallthrough
CT: control target
= control target key end

     0   :  { %s1366_s0 = inlined_call_operand.<no memory space> [shape: f32[1,1], index: 0, kind: input, shape index: {}]   ;;  %s1367_s1 = inlined_call_operand.vmem [shape: f32[2,8,64], index: 1, kind: input, shape index: {}]   ;;  %s1368_s2 = inlined_call_operand.vmem [shape: f32[2,8,64], index: 2, kind: input, shape index: {}]   ;;  %s1369_s3 = inlined_call_operand.vmem [shape: f32[64,64], index: 3, kind: input, shape index: {}]   ;;  %s1370_s4 = inlined_call_operand.vmem [shape: f32[1,64], index: 4, kind: input, shape index: {}]   ;;  %s1371_s5 = inlined_call_operand.vmem [shape: f32[2,8,64], index: 5, kind: input, shape index: {}]   ;;  %s1372_s6 = inlined_call_operand.vmem [shape: f32[2,8,64], index: 6, kind: input, shape index: {}]   ;;  %s1373_s7 = inlined_call_operand.vmem [shape: f32[64,64], index: 7, kind: input, shape index: {}]   ;;  %s1374_s8 = inlined_call_operand.vmem [shape: f32[1,64], index: 8, kind: input, shape index: {}]   ;;  %s1375_s9 = inlined_call_operand.hbm [shape: f32[2,8,8], index: 9, kind: output, shape index: {}]  }
   0x1   :  { %14 = sst [smem:[#allocation2]] %s1366_s0 }
   0x2   :  { %15 = vsyncpa [#allocation4], 0 }
   0x3   :  { %17 = vsyncpa [#allocation4 + $0x1], 0  ;;  %s1166_s11 = smov 0   ;;  %s1168_s12 = smov 0  }
   0x4   :  { %s1170_s13 = smov 0   ;;  %s1172_s14 = smov 0  }
   0x5   :  { %s1174_s15 = smov 0   ;;  %s1176_s16 = smov 0  }
   0x6 LB: > { %s883_s0 = sadd.s32 4294967295, %s1108_s16   ;;  %s884_s17 = sadd.s32 4294967294, %s1108_s16   ;;  %s1108_s16 = sphi %s1176_s16, %s23_s16   ;;  %s1104_s15 = sphi %s1174_s15, %s1382_s15   ;;  %s1100_s14 = sphi %s1172_s14, %s1381_s14   ;;  %s1096_s13 = sphi %s1170_s13, %s1380_s13   ;;  %s1092_s12 = sphi %s1168_s12, %s1379_s12   ;;  %s1088_s11 = sphi %s1166_s11, %s1378_s11  }
   0x7   : > { %s35_s18 = sadd.s32 1, %s1104_s15  ;;  %s257_s19 = sadd.s32 1, %s1096_s13 }
   0x8   : > { %p37_p0 = scmp.ge.s32.totalorder %s35_s18, 2  ;;  %p267_p1 = scmp.ne.s32.totalorder %s1096_s13, %s1092_s12 }
   0x9   : > { %p268_p2 = scmp.eq.s32.totalorder %s883_s0, 1  ;;  %p273_p3 = scmp.ne.s32.totalorder %s1092_s12, %s1088_s11 }
   0xa   : > { %s1384_s18 = smov (%p37_p0, %s35_s18), 0  ;;  %p274_p5 = scmp.eq.s32.totalorder %s884_s17, 1 }
   0xb   : > { %p1206_p4 = por %p268_p2, %p267_p1  ;;  %s252_s21 = ssub.s32 %s1104_s15, %s1384_s18 }
   0xc   : > { %p887_p6 = scmp.ge.s32.totalorder %s1108_s16, 1  ;;  %p255_p7 = scmp.eq.s32.totalorder %s252_s21, 0 }
   0xd   : > { %p1213_p8 = por %p274_p5, %p273_p3  ;;  %p341_p9 = scmp.lt.s32.totalorder %s1108_s16, 3 }
   0xe   : > { %s1219_s23 = scalar_select %p255_p7, %s1096_s13, %s257_s19  }
   0xf   : > { %p342_p10 = pnand %p887_p6, %p341_p9 }
  0x10   : > { %p394_p11 = scmp.lt.s32.totalorder (!%p342_p10), %s1100_s14, 1  ;;  %s749_s29 = sld [smem:[#allocation2]] (!%p342_p10) }
  0x11   : > { %345 = sbr.rel (%p342_p10) target bundleno = 655 (0x28f), region = 56  ;;  %s391_s30 = sand.u32 (!%p342_p10), 1, %s1092_s12  }
  0x12   : > { %s759_s27 = scalar_lea.sflag (!%p342_p10), [#allocation4], %s391_s30 }
  0x16   : > { %v425_v0 = vld [vmem:[%s1369_s3 + $0x38] sm:$0xff]  ;;  %v1110_v1 = vmov 0.0   ;;  %v424_v2 = vld [vmem:[%s1369_s3 + $0x30] sm:$0xff]  ;;  %vm1111_vm0 = vmmov 0   ;;  %s395_s28 = scalar_select %p394_p11, %s1100_s14, 1  ;;  %v423_v3 = vld [vmem:[%s1369_s3 + $0x28] sm:$0xff]  ;;  %v753_v32 = vstv %s749_s29 }
  0x17   : > { %927 = vmatprep.subr.mxu0 %v1110_v1  ;;  %943 = vmatprep.mubr.msk.f32.mxu0 %vm1111_vm0, %v1110_v1  ;;  %v422_v4 = vld [vmem:[%s1369_s3 + $0x20] sm:$0xff]  ;;  %vm433_vm1 = vcmask 523264   ;;  %v421_v6 = vld [vmem:[%s1369_s3 + $0x18] sm:$0xff]  ;;  %v420_v7 = vld [vmem:[%s1369_s3 + $0x10] sm:$0xff]  ;;  %s750_s0 = ssub.f32 1.0, %s749_s29  ;;  %vm756_vm2 = vcmask 64512  }
  0x18   : > { %928 = vmatpush3.msra.mxu0 %v425_v0  ;;  %946 = vmatprep.subr.mxu1 %v1110_v1  ;;  %s1239_s10 = sshll.u32 %s395_s28, 3  ;;  %v419_v8 = vld [vmem:[%s1369_s3 + $0x8] sm:$0xff]  ;;  %v418_v9 = vld [vmem:[%s1369_s3] sm:$0xff]  ;;  %v592_v14 = vld [vmem:[%s1373_s7 + $0x38] sm:$0xff] }
  0x19   : > { %929 = vmatprep.subr.mxu0 %v1110_v1  ;;  %948 = vmatprep.mubr.msk.f32.mxu1 %vm1111_vm0, %v1110_v1  ;;  %s404_s24 = scalar_lea.vmem %s1368_s2, %s1239_s10  ;;  %s400_s19 = scalar_lea.vmem %s1367_s1, %s1239_s10  ;;  %v893_v11 = vld [vmem:[%s1370_s4] ss:$0 sm:$0xff]  ;;  %v591_v16 = vld [vmem:[%s1373_s7 + $0x30] sm:$0xff]  ;;  %v590_v17 = vld [vmem:[%s1373_s7 + $0x28] sm:$0xff]  ;;  %v751_v31 = vstv %s750_s0 }
  0x1a   : > { %930 = vmatpush3.msra.mxu0 %v424_v2  ;;  %v417_v5 = vld [vmem:[%s404_s24] sm:$0xff]  ;;  %v588_v19 = vld [vmem:[%s1373_s7 + $0x18] sm:$0xff]  ;;  %v587_v20 = vld [vmem:[%s1373_s7 + $0x10] sm:$0xff]  ;;  %s411_s17 = scalar_lea.vmem %s1371_s5, %s1239_s10  ;;  %s415_s26 = scalar_lea.vmem %s1372_s6, %s1239_s10 }
  0x1b   : > { %931 = vmatprep.subr.mxu0 %v1110_v1  ;;  %947 = vmatpush3.xpose.msk.msra.mxu1 %vm433_vm1, %v417_v5  ;;  %v416_v10 = vld [vmem:[%s400_s19] sm:$0xff]  ;;  %v586_v21 = vld [vmem:[%s1373_s7 + $0x8] sm:$0xff]  ;;  %s902_s10 = sshll.u32 %s1100_s14, 7  ;;  %s1112_s14 = smov [#allocation3]  }
  0x1c   : > { %932 = vmatpush3.msra.mxu0 %v423_v3  ;;  %951 = vmatprep.subr.mxu1 %v1110_v1  ;;  %v589_v18 = vld [vmem:[%s1373_s7 + $0x20] sm:$0xff]  ;;  %s1036_s29 = sshll.u32 %s1112_s14, 4  ;;  %s1037_s29 = int_to_ptr.vmem [resolvable:$false] %s1036_s29 }
  0x1d   : > { %933 = vmatprep.subr.mxu0 %v1110_v1  ;;  %v585_v22 = vld [vmem:[%s1373_s7] sm:$0xff]  ;;  %s1038_s0 = scalar_lea.vmem %s1037_s29, 256 }
  0x1e   : > { %934 = vmatpush3.msra.mxu0 %v422_v4  ;;  %v583_v23 = vld [vmem:[%s411_s17] sm:$0xff]  ;;  %s888_s17 = sshll.u32 %s391_s30, 3 }
  0x1f   : > { %935 = vmatprep.subr.mxu0 %v1110_v1  ;;  %v584_v24 = vld [vmem:[%s415_s26] sm:$0xff]  ;;  %s393_s19 = scalar_lea.vmem [#allocation3], %s888_s17  ;;  %s771_s26 = scalar_lea.hbm %s1375_s9, %s902_s10 }
  0x20   : > { %936 = vmatpush3.msra.mxu0 %v421_v6  ;;  %v897_v27 = vld [vmem:[%s1374_s8] ss:$0 sm:$0xff]  ;;  %s773_s21 = sshll.u32 %s393_s19, 4  ;;  %s774_s21 = int_to_ptr.vmem [resolvable:$true] %s773_s21 }
  0x21   : > { %937 = vmatprep.subr.mxu0 %v1110_v1  ;;  %s1032_s28 = scalar_lea.vmem %s774_s21, 128  ;;  %p1039_p1 = scmp.lt.s32.totalorder %s774_s21, %s1037_s29 }
  0x22   : > { %938 = vmatpush3.msra.mxu0 %v420_v7  ;;  %p1033_p12 = scmp.ne.s32.totalorder %s774_s21, %s1032_s28  ;;  %p1040_p2 = scmp.lt.s32.totalorder %s1038_s0, %s1032_s28 }
  0x23   : > { %939 = vmatprep.subr.mxu0 %v1110_v1 }
  0x24   : > { %940 = vmatpush3.msra.mxu0 %v419_v8  ;;  %p1034_p13 = pnand %p1033_p12, %p1206_p4  ;;  %p1041_p3 = por %p1040_p2, %p1039_p1 }
  0x25   : > { %941 = vmatprep.subr.mxu0 %v1110_v1 }
  0x26   : > { %942 = vmatpush3.msra.mxu0 %v418_v9  ;;  %p1035_p0 = pneg %p1034_p13 }
  0x27   : > { %944 = vmatmul.mubr.msk.f32.vlgmr.msra.gmra.mxu0 %vm433_vm1, %v416_v10  ;;  %970 = vmatprep.subr.mxu0 %v1110_v1 }
  0x28   : > { %972 = vmatprep.mubr.msk.f32.mxu0 %vm1111_vm0, %v1110_v1  ;;  %971 = vmatpush3.xpose.msk.msra.mxu0 %vm433_vm1, %v584_v24  ;;  %p1042_p5 = pnand %p1041_p3, %p1035_p0 }
  0xe7   : > { %v503_v12 = vpop.f32.mrf.mxu0 }
  0xe8   : > { %v504_v13 = vadd.f32 %v893_v11, %v503_v12 }
  0xe9   : > { %v945_v15 = vpop.f32.mrf.mxu0 }
  0xea   : > { %949 = vmatmul.mubr.msk.f32.vlgmr.msra.gmra.mxu1 %vm433_vm1, %v504_v13 }
  0xeb   : > { %952 = vmatpush3.msra.mxu1 %v592_v14  ;;  %967 = vmatprep.mubr.msk.f32.mxu1 %vm1111_vm0, %v1110_v1 }
  0xec   : > { %953 = vmatprep.subr.mxu1 %v1110_v1 }
  0xed   : > { %954 = vmatpush3.msra.mxu1 %v591_v16 }
  0xee   : > { %955 = vmatprep.subr.mxu1 %v1110_v1 }
  0xef   : > { %956 = vmatpush3.msra.mxu1 %v590_v17 }
  0xf0   : > { %957 = vmatprep.subr.mxu1 %v1110_v1 }
  0xf1   : > { %958 = vmatpush3.msra.mxu1 %v589_v18 }
  0xf2   : > { %959 = vmatprep.subr.mxu1 %v1110_v1 }
  0xf3   : > { %960 = vmatpush3.msra.mxu1 %v588_v19 }
  0xf4   : > { %961 = vmatprep.subr.mxu1 %v1110_v1 }
  0xf5   : > { %962 = vmatpush3.msra.mxu1 %v587_v20 }
  0xf6   : > { %963 = vmatprep.subr.mxu1 %v1110_v1 }
  0xf7   : > { %964 = vmatpush3.msra.mxu1 %v586_v21 }
  0xf8   : > { %965 = vmatprep.subr.mxu1 %v1110_v1 }
  0xf9   : > { %966 = vmatpush3.msra.mxu1 %v585_v22 }
  0xfa   : > { %968 = vmatmul.mubr.msk.f32.vlgmr.msra.gmra.mxu1 %vm433_vm1, %v583_v23 }
 0x1aa   : > { %v579_v25 = vpop.f32.mrf.mxu1 }
 0x1ab   : > { %v752_v34 = vmul.f32 %v751_v31, %v579_v25 }
 0x1ac   : > { %v950_v26 = vpop.f32.mrf.mxu1 }
 0x1ba   : > { %v669_v28 = vpop.f32.mrf.mxu1 }
 0x1bb   : > { %v670_v29 = vadd.f32 %v897_v27, %v669_v28 }
 0x1bc   : > { %v969_v30 = vpop.f32.mrf.mxu1 }
 0x1bd   : > { %973 = vmatmul.mubr.msk.f32.vlgmr.msra.gmra.mxu0 %vm433_vm1, %v670_v29 }
 0x27d   : > { %v745_v33 = vpop.f32.mrf.mxu0 }
 0x27e   : > { %v754_v35 = vmul.f32 %v753_v32, %v745_v33 }
 0x27f   : > { %v974_v36 = vpop.f32.mrf.mxu0 }
 0x280   : > { %v755_v37 = vadd.f32 %v754_v35, %v752_v34 }
 0x282   : > { %757 = vst.msk [vmem:[%s393_s19] sm:$0xff] %vm756_vm2, %v755_v37 }
 0x283   : > { %1045 = shalt.err (!%p1042_p5)
}
 0x284   : > { %s1046_s17 = scalar_lea.hbm %s771_s26, 128  ;;  %s1050_s19 = scalar_lea.hbm %s1375_s9, 256 }
 0x285   : > { %p1047_p6 = scmp.ne.s32.totalorder %s771_s26, %s1046_s17  ;;  %p1051_p10 = scmp.lt.s32.totalorder %s771_s26, %s1375_s9 }
 0x286   : > { %p1052_p11 = scmp.lt.s32.totalorder %s1050_s19, %s1046_s17 }
 0x287   : > { %p1048_p7 = pnand %p1047_p6, %p1206_p4 }
 0x288   : > { %p1053_p12 = por %p1052_p11, %p1051_p10 }
 0x289   : > { %p1049_p9 = pneg %p1048_p7 }
 0x28b   : > { %p1054_p13 = pnand %p1053_p12, %p1049_p9 }
 0x28d   : > { %1057 = shalt.err (!%p1054_p13)
}
 0x28e   : > { %975 = dma.vmem_to_hbm [thread:$0]  (%p1206_p4), %s774_s21, 128, %s771_s26, %s759_s27  }
 0x28f PF: > { %p981_p0 = scmp.ge.s32.totalorder %s1108_s16, 2  ;;  %s785_s28 = sand.u32 1, %s1088_s11  }
 0x290   : > { %s786_s14 = scalar_lea.sflag [#allocation4], %s785_s28 }
 0x291   : > { %p978_p1 = pnand %p981_p0, %p1213_p8 }
 0x293   : > { %p979_p2 = pneg %p978_p1 }
 0x295   : > { %1083 = dma.done.wait (%p979_p2), %s786_s14, 128  }
 0x296   : > { %1085 = vsyncadd (%p979_p2), %s786_s14, 4294967168  ;;  %s23_s16 = sadd.s32 1, %s1108_s16   ;;  %s1378_s11 = smov %s1092_s12 }
 0x297   : > { %p20_p3 = scmp.ge.s32.totalorder %s23_s16, 4   ;;  %s1379_s12 = smov %s1096_s13 }
 0x298   : > { %s1380_s13 = smov %s1219_s23  ;;  %s1381_s14 = smov %s1104_s15 }
 0x299   : > { %s1382_s15 = smov %s1384_s18  ;;  %22 = sbr.rel (!%p20_p3) target bundleno = 6 (0x6), region = 100 }
 0x29e   :  { %791 = vsyncpa [#allocation4], 1 }
 0x29f   :  { %793 = vsyncpa [#allocation4 + $0x1], 1 }

// kernel: _lambda_.7
= control target key start
LH: loop header
LB: loop body
LE: loop exit
PB: predicated region body
PF: predicated region fallthrough
CT: control target
= control target key end

     0   :  { %s4269_s27 = smov 0   ;;  %s4271_s28 = smov 0   ;;  %s4945_s0 = inlined_call_operand.<no memory space> [shape: f32[1,1], index: 0, kind: input, shape index: {}]   ;;  %s4946_s1 = inlined_call_operand.vmem [shape: f32[2,8,32], index: 1, kind: input, shape index: {}]   ;;  %s4947_s2 = inlined_call_operand.vmem [shape: f32[2,8,32], index: 2, kind: input, shape index: {}]   ;;  %s4948_s3 = inlined_call_operand.vmem [shape: f32[8,32,32], index: 3, kind: input, shape index: {}]   ;;  %s4949_s4 = inlined_call_operand.vmem [shape: f32[8,32], index: 4, kind: input, shape index: {}]   ;;  %s4950_s5 = inlined_call_operand.vmem [shape: f32[8,32], index: 5, kind: input, shape index: {}]   ;;  %s4951_s6 = inlined_call_operand.vmem [shape: f32[8,1], index: 6, kind: input, shape index: {}]   ;;  %s4952_s7 = inlined_call_operand.vmem [shape: f32[2,8,32], index: 7, kind: input, shape index: {}]   ;;  %s4953_s8 = inlined_call_operand.vmem [shape: f32[2,8,32], index: 8, kind: input, shape index: {}]   ;;  %s4954_s9 = inlined_call_operand.vmem [shape: f32[8,32,32], index: 9, kind: input, shape index: {}]   ;;  %s4955_s10 = inlined_call_operand.vmem [shape: f32[8,32], index: 10, kind: input, shape index: {}]   ;;  %s4956_s11 = inlined_call_operand.vmem [shape: f32[8,32], index: 11, kind: input, shape index: {}]   ;;  %s4957_s12 = inlined_call_operand.vmem [shape: f32[8,1], index: 12, kind: input, shape index: {}]   ;;  %s4958_s13 = inlined_call_operand.vmem [shape: f32[2,8,8,8], index: 13, kind: output, shape index: {}]  }
   0x1   :  { %18 = sst [smem:[#allocation2]] %s4945_s0  ;;  %s4273_s29 = smov 0  }
   0x2 LB: > { %s36_s0 = sadd.s32 1, %s4186_s28  ;;  %p3677_p0 = scmp.ge.s32.totalorder %s4190_s29, 1  ;;  %s4190_s29 = sphi %s4273_s29, %s24_s29   ;;  %s4186_s28 = sphi %s4271_s28, %s4960_s28   ;;  %s4182_s27 = sphi %s4269_s27, %s4959_s27  }
   0x3   : > { %p38_p1 = scmp.ge.s32.totalorder %s36_s0, 2  ;;  %p438_p2 = scmp.lt.s32.totalorder %s4190_s29, 3 }
   0x5   : > { %s4962_s0 = smov (%p38_p1, %s36_s0), 0  ;;  %p439_p3 = pnand %p3677_p0, %p438_p2 }
   0x6   : > { %p502_p4 = scmp.lt.s32.totalorder (!%p439_p3), %s4182_s27, 1 }
   0x7   : > { %442 = sbr.rel (%p439_p3) target bundleno = 679 (0x2a7), region = 72 }
   0xc   : > { %v537_v0 = vld [vmem:[%s4948_s3 + $0x18] sm:$0xff]  ;;  %v4192_v2 = vmov 0.0   ;;  %v536_v3 = vld [vmem:[%s4948_s3 + $0x10] sm:$0xff]  ;;  %s4964_s27 = smov (!%p502_p4, %s4182_s27), 1  ;;  %v535_v5 = vld [vmem:[%s4948_s3 + $0x8] sm:$0xff]  ;;  %vm566_vm0 = vcmask 261120   ;;  %v1292_v60 = vlaneseq }
   0xd   : > { %v541_v1 = vld [vmem:[%s4948_s3 + $0x38] sm:$0xff]  ;;  %3863 = vmatprep.subr.mxu0 %v4192_v2  ;;  %3874 = vmatprep.subr.mxu1 %v4192_v2  ;;  %v540_v4 = vld [vmem:[%s4948_s3 + $0x30] sm:$0xff]  ;;  %v539_v6 = vld [vmem:[%s4948_s3 + $0x28] sm:$0xff]  ;;  %s4312_s25 = sshll.u32 %s4964_s27, 3  ;;  %vm4193_vm1 = vmmov 0   ;;  %v4194_v37 = vmov 0  }
   0xe   : > { %3864 = vmatpush3.msra.mxu0 %v537_v0  ;;  %3875 = vmatpush3.msra.mxu1 %v541_v1  ;;  %v534_v7 = vld [vmem:[%s4948_s3] sm:$0xff]  ;;  %s508_s16 = scalar_lea.vmem %s4946_s1, %s4312_s25  ;;  %v545_v10 = vld [vmem:[%s4948_s3 + $0x58] sm:$0xff]  ;;  %v544_v12 = vld [vmem:[%s4948_s3 + $0x50] sm:$0xff]  ;;  %s512_s17 = scalar_lea.vmem %s4947_s2, %s4312_s25  ;;  %v4195_v54 = vmov 1966171168   ;;  %vm3545_vm2 = vcmask 64512  }
   0xf   : > { %3865 = vmatprep.subr.mxu0 %v4192_v2  ;;  %3876 = vmatprep.subr.mxu1 %v4192_v2  ;;  %v538_v8 = vld [vmem:[%s4948_s3 + $0x20] sm:$0xff]  ;;  %v549_v11 = vld [vmem:[%s4948_s3 + $0x78] sm:$0xff]  ;;  %v548_v13 = vld [vmem:[%s4948_s3 + $0x70] sm:$0xff]  ;;  %v1290_v55 = vunpack.c.l.s4 %v4195_v54  ;;  %s519_s14 = scalar_lea.vmem %s4952_s7, %s4312_s25  ;;  %s523_s19 = scalar_lea.vmem %s4953_s8, %s4312_s25 }
  0x10   : > { %3866 = vmatpush3.msra.mxu0 %v536_v3  ;;  %3877 = vmatpush3.msra.mxu1 %v540_v4  ;;  %v4328_v9 = vld [vmem:[%s508_s16] sm:$0xff]  ;;  %v543_v14 = vld [vmem:[%s4948_s3 + $0x48] sm:$0xff]  ;;  %v553_v18 = vld [vmem:[%s4948_s3 + $0x98] sm:$0xff]  ;;  %s3517_s25 = sld [smem:[#allocation2]]  ;;  %s3742_s23 = sshll.u32 %s4964_s27, 6 }
  0x11   : > { %3867 = vmatprep.subr.mxu0 %v4192_v2  ;;  %3878 = vmatprep.subr.mxu1 %v4192_v2  ;;  %v547_v15 = vld [vmem:[%s4948_s3 + $0x68] sm:$0xff]  ;;  %v542_v16 = vld [vmem:[%s4948_s3 + $0x40] sm:$0xff]  ;;  %v557_v19 = vld [vmem:[%s4948_s3 + $0xb8] sm:$0xff]  ;;  %v1291_v1 = vunpack.c.0.s8 %v1290_v55  ;;  %s4886_s30 = scalar_lea.vmem %s4958_s13, %s3742_s23 }
  0x12   : > { %3868 = vmatpush3.msra.mxu0 %v535_v5  ;;  %3879 = vmatpush3.msra.mxu1 %v539_v6  ;;  %v546_v17 = vld [vmem:[%s4948_s3 + $0x60] sm:$0xff]  ;;  %v552_v20 = vld [vmem:[%s4948_s3 + $0x90] sm:$0xff]  ;;  %v551_v22 = vld [vmem:[%s4948_s3 + $0x88] sm:$0xff]  ;;  %v4558_v5 = vshrl.u32 %v1292_v60, 7 }
  0x13   : > { %3869 = vmatprep.subr.mxu0 %v4192_v2  ;;  %3880 = vmatprep.subr.mxu1 %v4192_v2  ;;  %v556_v21 = vld [vmem:[%s4948_s3 + $0xb0] sm:$0xff]  ;;  %v555_v23 = vld [vmem:[%s4948_s3 + $0xa8] sm:$0xff]  ;;  %v550_v24 = vld [vmem:[%s4948_s3 + $0x80] sm:$0xff] }
  0x14   : > { %3870 = vmatpush3.msra.mxu0 %v534_v7  ;;  %3871 = vmatprep.mubr.msk.f32.mxu0 %vm4193_vm1, %v4192_v2  ;;  %v554_v25 = vld [vmem:[%s4948_s3 + $0xa0] sm:$0xff]  ;;  %v561_v26 = vld [vmem:[%s4948_s3 + $0xd8] sm:$0xff]  ;;  %v560_v28 = vld [vmem:[%s4948_s3 + $0xd0] sm:$0xff]  ;;  %v2005_v54 = vsub.s32 6, %v4558_v5 }
  0x15   : > { %3881 = vmatpush3.msra.mxu1 %v538_v8  ;;  %3882 = vmatprep.mubr.msk.f32.mxu1 %vm4193_vm1, %v4192_v2  ;;  %v565_v27 = vld [vmem:[%s4948_s3 + $0xf8] sm:$0xff]  ;;  %v564_v29 = vld [vmem:[%s4948_s3 + $0xf0] sm:$0xff]  ;;  %v559_v30 = vld [vmem:[%s4948_s3 + $0xc8] sm:$0xff] }
  0x16   : > { %3872 = vmatmul.mubr.msk.f32.vlgmr.msra.gmra.mxu0 %vm566_vm0, %v4328_v9  ;;  %3883 = vmatmul.mubr.msk.f32.vlgmr.msra.gmra.mxu1 %vm566_vm0, %v4328_v9  ;;  %v563_v31 = vld [vmem:[%s4948_s3 + $0xe8] sm:$0xff]  ;;  %v558_v32 = vld [vmem:[%s4948_s3 + $0xc0] sm:$0xff]  ;;  %v2030_v52 = vld [vmem:[%s4954_s9 + $0x18] sm:$0xff]  ;;  %s3518_s22 = ssub.f32 1.0, %s3517_s25 }
  0x17   : > { %3885 = vmatprep.subr.mxu0 %v4192_v2  ;;  %3896 = vmatprep.subr.mxu1 %v4192_v2  ;;  %v562_v33 = vld [vmem:[%s4948_s3 + $0xe0] sm:$0xff]  ;;  %v2034_v53 = vld [vmem:[%s4954_s9 + $0x38] sm:$0xff]  ;;  %v2029_v58 = vld [vmem:[%s4954_s9 + $0x10] sm:$0xff] }
  0x18   : > { %3886 = vmatpush3.msra.mxu0 %v545_v10  ;;  %3897 = vmatpush3.msra.mxu1 %v549_v11  ;;  %v1208_v34 = vld [vmem:[%s4951_s6] sm:$0xff]  ;;  %v2033_v59 = vld [vmem:[%s4954_s9 + $0x30] sm:$0xff]  ;;  %v2028_v63 = vld [vmem:[%s4954_s9 + $0x8] sm:$0xff] }
  0x19   : > { %3887 = vmatprep.subr.mxu0 %v4192_v2  ;;  %3898 = vmatprep.subr.mxu1 %v4192_v2  ;;  %v533_v35 = vld [vmem:[%s512_s17] sm:$0xff]  ;;  %v2032_v0 = vld [vmem:[%s4954_s9 + $0x28] sm:$0xff]  ;;  %v2038_v11 = vld [vmem:[%s4954_s9 + $0x58] sm:$0xff] }
  0x1a   : > { %3888 = vmatpush3.msra.mxu0 %v544_v12  ;;  %3899 = vmatpush3.msra.mxu1 %v548_v13  ;;  %v1207_v36 = vld [vmem:[%s4950_s5] sm:$0xff]  ;;  %v2042_v12 = vld [vmem:[%s4954_s9 + $0x78] sm:$0xff] }
  0x1b   : > { %3889 = vmatprep.subr.mxu0 %v4192_v2  ;;  %3900 = vmatprep.subr.mxu1 %v4192_v2  ;;  %v1130_v38 = vld [vmem:[%s4949_s4] sm:$0xff] }
  0x1c   : > { %3890 = vmatpush3.msra.mxu0 %v543_v14  ;;  %3901 = vmatpush3.msra.mxu1 %v547_v15  ;;  %v2700_v39 = vld [vmem:[%s4957_s12] sm:$0xff]  ;;  %v2037_v15 = vld [vmem:[%s4954_s9 + $0x50] sm:$0xff] }
  0x1d   : > { %3891 = vmatprep.subr.mxu0 %v4192_v2  ;;  %3902 = vmatprep.subr.mxu1 %v4192_v2  ;;  %v2027_v3 = vld [vmem:[%s4954_s9] sm:$0xff] }
  0x1e   : > { %3892 = vmatpush3.msra.mxu0 %v542_v16  ;;  %3893 = vmatprep.mubr.msk.f32.mxu0 %vm4193_vm1, %v4192_v2  ;;  %v2031_v6 = vld [vmem:[%s4954_s9 + $0x20] sm:$0xff]  ;;  %v2041_v16 = vld [vmem:[%s4954_s9 + $0x70] sm:$0xff] }
  0x1f   : > { %3903 = vmatpush3.msra.mxu1 %v546_v17  ;;  %3904 = vmatprep.mubr.msk.f32.mxu1 %vm4193_vm1, %v4192_v2  ;;  %v4565_v7 = vld [vmem:[%s519_s14] sm:$0xff] }
  0x20   : > { %3894 = vmatmul.mubr.msk.f32.vlgmr.msra.gmra.mxu0 %vm566_vm0, %v4328_v9  ;;  %3905 = vmatmul.mubr.msk.f32.vlgmr.msra.gmra.mxu1 %vm566_vm0, %v4328_v9 }
  0x21   : > { %3907 = vmatprep.subr.mxu0 %v4192_v2  ;;  %3918 = vmatprep.subr.mxu1 %v4192_v2 }
  0x22   : > { %3908 = vmatpush3.msra.mxu0 %v553_v18  ;;  %3919 = vmatpush3.msra.mxu1 %v557_v19  ;;  %v2036_v19 = vld [vmem:[%s4954_s9 + $0x48] sm:$0xff] }
  0x23   : > { %3909 = vmatprep.subr.mxu0 %v4192_v2  ;;  %3920 = vmatprep.subr.mxu1 %v4192_v2 }
  0x24   : > { %3910 = vmatpush3.msra.mxu0 %v552_v20  ;;  %3921 = vmatpush3.msra.mxu1 %v556_v21  ;;  %v2040_v20 = vld [vmem:[%s4954_s9 + $0x68] sm:$0xff] }
  0x25   : > { %3911 = vmatprep.subr.mxu0 %v4192_v2  ;;  %3922 = vmatprep.subr.mxu1 %v4192_v2 }
  0x26   : > { %3912 = vmatpush3.msra.mxu0 %v551_v22  ;;  %3923 = vmatpush3.msra.mxu1 %v555_v23  ;;  %v2035_v22 = vld [vmem:[%s4954_s9 + $0x40] sm:$0xff] }
  0x27   : > { %3913 = vmatprep.subr.mxu0 %v4192_v2  ;;  %3924 = vmatprep.subr.mxu1 %v4192_v2  ;;  %v2039_v23 = vld [vmem:[%s4954_s9 + $0x60] sm:$0xff] }
  0x28   : > { %3914 = vmatpush3.msra.mxu0 %v550_v24  ;;  %3915 = vmatprep.mubr.msk.f32.mxu0 %vm4193_vm1, %v4192_v2  ;;  %v2046_v24 = vld [vmem:[%s4954_s9 + $0x98] sm:$0xff] }
  0x29   : > { %3925 = vmatpush3.msra.mxu1 %v554_v25  ;;  %3926 = vmatprep.mubr.msk.f32.mxu1 %vm4193_vm1, %v4192_v2  ;;  %v2050_v25 = vld [vmem:[%s4954_s9 + $0xb8] sm:$0xff] }
  0x2a   : > { %3916 = vmatmul.mubr.msk.f32.vlgmr.msra.gmra.mxu0 %vm566_vm0, %v4328_v9  ;;  %3927 = vmatmul.mubr.msk.f32.vlgmr.msra.gmra.mxu1 %vm566_vm0, %v4328_v9 }
  0x2b   : > { %3929 = vmatprep.subr.mxu0 %v4192_v2  ;;  %3940 = vmatprep.subr.mxu1 %v4192_v2 }
  0x2c   : > { %3930 = vmatpush3.msra.mxu0 %v561_v26  ;;  %3941 = vmatpush3.msra.mxu1 %v565_v27  ;;  %v2045_v26 = vld [vmem:[%s4954_s9 + $0x90] sm:$0xff] }
  0x2d   : > { %3931 = vmatprep.subr.mxu0 %v4192_v2  ;;  %3942 = vmatprep.subr.mxu1 %v4192_v2  ;;  %v2049_v27 = vld [vmem:[%s4954_s9 + $0xb0] sm:$0xff] }
  0x2e   : > { %3932 = vmatpush3.msra.mxu0 %v560_v28  ;;  %3943 = vmatpush3.msra.mxu1 %v564_v29  ;;  %v2044_v28 = vld [vmem:[%s4954_s9 + $0x88] sm:$0xff] }
  0x2f   : > { %3933 = vmatprep.subr.mxu0 %v4192_v2  ;;  %3944 = vmatprep.subr.mxu1 %v4192_v2  ;;  %v2048_v29 = vld [vmem:[%s4954_s9 + $0xa8] sm:$0xff] }
  0x30   : > { %3934 = vmatpush3.msra.mxu0 %v559_v30  ;;  %3945 = vmatpush3.msra.mxu1 %v563_v31  ;;  %v2043_v30 = vld [vmem:[%s4954_s9 + $0x80] sm:$0xff] }
  0x31   : > { %3935 = vmatprep.subr.mxu0 %v4192_v2  ;;  %3946 = vmatprep.subr.mxu1 %v4192_v2  ;;  %v2047_v31 = vld [vmem:[%s4954_s9 + $0xa0] sm:$0xff] }
  0x32   : > { %3936 = vmatpush3.msra.mxu0 %v558_v32  ;;  %3937 = vmatprep.mubr.msk.f32.mxu0 %vm4193_vm1, %v4192_v2  ;;  %v2054_v32 = vld [vmem:[%s4954_s9 + $0xd8] sm:$0xff] }
  0x33   : > { %3947 = vmatpush3.msra.mxu1 %v562_v33  ;;  %3948 = vmatprep.mubr.msk.f32.mxu1 %vm4193_vm1, %v4192_v2  ;;  %v2058_v33 = vld [vmem:[%s4954_s9 + $0xf8] sm:$0xff] }
  0x34   : > { %3938 = vmatmul.mubr.msk.f32.vlgmr.msra.gmra.mxu0 %vm566_vm0, %v4328_v9  ;;  %3949 = vmatmul.mubr.msk.f32.vlgmr.msra.gmra.mxu1 %vm566_vm0, %v4328_v9 }
  0x35   : > { %3956 = vmatprep.subr.mxu1 %v4192_v2  ;;  %3958 = vmatprep.mubr.msk.f32.mxu1 %vm4193_vm1, %v4192_v2 }
  0x36   : > { %3957 = vmatpush3.xpose.msk.msra.mxu1 %vm566_vm0, %v4328_v9  ;;  %4167 = vset.pattern.permute.xlu0 %v4194_v37  ;;  %v4568_v9 = vsub.s32 %v1291_v1, %v4558_v5  ;;  %v2052_v37 = vld [vmem:[%s4954_s9 + $0xc8] sm:$0xff]  ;;  %v2622_v1 = vld [vmem:[%s4955_s10] sm:$0xff] }
  0x37   : > { %1211 = vperm.xlu0 %4167, %v1208_v34   ;;  %3951 = vmatprep.subr.mxu0 %v4192_v2 }
  0x38   : > { %3952 = vmatpush3.xpose.msk.msra.mxu0 %vm566_vm0, %v533_v35  ;;  %3953 = vmatprep.mubr.msk.f32.mxu0 %vm4193_vm1, %v4192_v2 }
  0x39   : > { %3959 = vmatmul.mubr.msk.f32.vlgmr.msra.gmra.mxu1 %vm566_vm0, %v1207_v36  ;;  %3961 = vmatprep.subr.mxu0 %v4192_v2  ;;  %v2057_v36 = vld [vmem:[%s4954_s9 + $0xf0] sm:$0xff] }
  0x3a   : > { %3966 = vmatprep.subr.mxu1 %v4192_v2  ;;  %3968 = vmatprep.mubr.msk.f32.mxu1 %vm4193_vm1, %v4192_v2 }
  0x3b   : > { %3954 = vmatmul.mubr.msk.f32.vlgmr.msra.gmra.mxu0 %vm566_vm0, %v1130_v38  ;;  %3967 = vmatpush3.xpose.msk.msra.mxu1 %vm566_vm0, %v533_v35  ;;  %v2056_v38 = vld [vmem:[%s4954_s9 + $0xe8] sm:$0xff] }
  0x3c   : > { %3962 = vmatpush3.xpose.msk.msra.mxu0 %vm566_vm0, %v533_v35  ;;  %3963 = vmatprep.mubr.msk.f32.mxu0 %vm4193_vm1, %v4192_v2 }
  0x3d   : > { %3971 = vmatprep.subr.mxu0 %v4192_v2  ;;  %3976 = vmatprep.subr.mxu1 %v4192_v2 }
  0x3e   : > { %2703 = vperm.xlu0 %4167, %v2700_v39  }
  0xb2   : > { %v1212_v34 = vpop.permute.xlu0 %1211 }
  0xd6   : > { %v636_v40 = vpop.f32.mrf.mxu0  ;;  %v706_v41 = vpop.f32.mrf.mxu1 }
  0xd7   : > { %3964 = vmatmul.mubr.msk.f32.vlgmr.msra.gmra.mxu0 %vm566_vm0, %v636_v40  ;;  %3969 = vmatmul.mubr.msk.f32.vlgmr.msra.gmra.mxu1 %vm566_vm0, %v706_v41  ;;  %v4692_v40 = vsub.s32 0, %v4558_v5  ;;  %v2051_v41 = vld [vmem:[%s4954_s9 + $0xc0] sm:$0xff] }
  0xd8   : > { %v3873_v42 = vpop.f32.mrf.mxu0  ;;  %v3884_v43 = vpop.f32.mrf.mxu1  ;;  %3972 = vmatpush3.xpose.msk.msra.mxu0 %vm566_vm0, %v533_v35  ;;  %3977 = vmatpush3.xpose.msk.msra.mxu1 %vm566_vm0, %v533_v35 }
  0xd9   : > { %3973 = vmatprep.mubr.msk.f32.mxu0 %vm4193_vm1, %v4192_v2  ;;  %3978 = vmatprep.mubr.msk.f32.mxu1 %vm4193_vm1, %v4192_v2  ;;  %v1977_v42 = vsub.s32 2, %v4558_v5  ;;  %v2055_v43 = vld [vmem:[%s4954_s9 + $0xe0] sm:$0xff] }
  0xda   : > { %3981 = vmatprep.subr.mxu0 %v4192_v2  ;;  %3986 = vmatprep.subr.mxu1 %v4192_v2 }
  0xe0   : > { %v776_v44 = vpop.f32.mrf.mxu0  ;;  %v846_v45 = vpop.f32.mrf.mxu1 }
  0xe1   : > { %3974 = vmatmul.mubr.msk.f32.vlgmr.msra.gmra.mxu0 %vm566_vm0, %v776_v44  ;;  %3979 = vmatmul.mubr.msk.f32.vlgmr.msra.gmra.mxu1 %vm566_vm0, %v846_v45 }
  0xe2   : > { %v3895_v46 = vpop.f32.mrf.mxu0  ;;  %v3906_v47 = vpop.f32.mrf.mxu1  ;;  %3982 = vmatpush3.xpose.msk.msra.mxu0 %vm566_vm0, %v533_v35  ;;  %3987 = vmatpush3.xpose.msk.msra.mxu1 %vm566_vm0, %v533_v35 }
  0xe3   : > { %3983 = vmatprep.mubr.msk.f32.mxu0 %vm4193_vm1, %v4192_v2  ;;  %3988 = vmatprep.mubr.msk.f32.mxu1 %vm4193_vm1, %v4192_v2  ;;  %v1970_v46 = vsub.s32 1, %v4558_v5 }
  0xe4   : > { %3991 = vmatprep.subr.mxu0 %v4192_v2  ;;  %3996 = vmatprep.subr.mxu1 %v4192_v2 }
  0xea   : > { %v916_v48 = vpop.f32.mrf.mxu0  ;;  %v986_v49 = vpop.f32.mrf.mxu1 }
  0xeb   : > { %3984 = vmatmul.mubr.msk.f32.vlgmr.msra.gmra.mxu0 %vm566_vm0, %v916_v48  ;;  %3989 = vmatmul.mubr.msk.f32.vlgmr.msra.gmra.mxu1 %vm566_vm0, %v986_v49  ;;  %v1991_v48 = vsub.s32 4, %v4558_v5 }
  0xec   : > { %v3917_v50 = vpop.f32.mrf.mxu0  ;;  %v3928_v51 = vpop.f32.mrf.mxu1  ;;  %3992 = vmatpush3.xpose.msk.msra.mxu0 %vm566_vm0, %v533_v35  ;;  %3997 = vmatpush3.xpose.msk.msra.mxu1 %vm566_vm0, %v533_v35  ;;  %v2053_v35 = vld [vmem:[%s4954_s9 + $0xd0] sm:$0xff] }
  0xed   : > { %3993 = vmatprep.mubr.msk.f32.mxu0 %vm4193_vm1, %v4192_v2  ;;  %3998 = vmatprep.mubr.msk.f32.mxu1 %vm4193_vm1, %v4192_v2  ;;  %v1984_v51 = vsub.s32 3, %v4558_v5 }
  0xee   : > { %4001 = vmatprep.subr.mxu0 %v4192_v2  ;;  %4012 = vmatprep.subr.mxu1 %v4192_v2 }
  0xf4   : > { %v1056_v56 = vpop.f32.mrf.mxu0  ;;  %v1126_v57 = vpop.f32.mrf.mxu1 }
  0xf5   : > { %3994 = vmatmul.mubr.msk.f32.vlgmr.msra.gmra.mxu0 %vm566_vm0, %v1056_v56  ;;  %3999 = vmatmul.mubr.msk.f32.vlgmr.msra.gmra.mxu1 %vm566_vm0, %v1126_v57  ;;  %v1998_v56 = vsub.s32 5, %v4558_v5 }
  0xf6   : > { %4002 = vmatpush3.msra.mxu0 %v2030_v52  ;;  %4013 = vmatpush3.msra.mxu1 %v2034_v53  ;;  %v3939_v61 = vpop.f32.mrf.mxu0  ;;  %v3950_v62 = vpop.f32.mrf.mxu1  ;;  %v2699_v52 = vld [vmem:[%s4956_s11] sm:$0xff] }
  0xf7   : > { %4003 = vmatprep.subr.mxu0 %v4192_v2  ;;  %4014 = vmatprep.subr.mxu1 %v4192_v2 }
  0xf8   : > { %4004 = vmatpush3.msra.mxu0 %v2029_v58  ;;  %4015 = vmatpush3.msra.mxu1 %v2033_v59  ;;  %v2012_v59 = vsub.s32 7, %v4558_v5 }
  0xf9   : > { %4005 = vmatprep.subr.mxu0 %v4192_v2  ;;  %4016 = vmatprep.subr.mxu1 %v4192_v2  ;;  %v4556_v4 = vpop.f32.mrf.mxu1 }
  0xfa   : > { %4006 = vmatpush3.msra.mxu0 %v2028_v63  ;;  %4017 = vmatpush3.msra.mxu1 %v2032_v0  ;;  %v1284_v39 = vadd.f32 %v4556_v4, %v1212_v34  ;;  %v4761_v0 = vld [vmem:[%s523_s19] sm:$0xff] }
  0xfb   : > { %4007 = vmatprep.subr.mxu0 %v4192_v2  ;;  %4018 = vmatprep.subr.mxu1 %v4192_v2  ;;  %v1203_v8 = vpop.f32.mrf.mxu0  ;;  %v3960_v10 = vpop.f32.mrf.mxu1 }
  0xfc   : > { %4008 = vmatpush3.msra.mxu0 %v2027_v3  ;;  %4009 = vmatprep.mubr.msk.f32.mxu0 %vm4193_vm1, %v4192_v2  ;;  %v1288_v14 = vcombine.high %v1203_v8, %v1203_v8  ;;  %v4593_v17 = vrot.slane %v1203_v8, %v4568_v9  ;;  %v1964_v45 = vrot.slane %v1284_v39, %v4692_v40 }
  0xfd   : > { %4019 = vmatpush3.msra.mxu1 %v2031_v6  ;;  %4020 = vmatprep.mubr.msk.f32.mxu1 %vm4193_vm1, %v4192_v2  ;;  %v3955_v13 = vpop.f32.mrf.mxu0  ;;  %v1978_v47 = vrot.slane %v1284_v39, %v1977_v42  ;;  %v1971_v50 = vrot.slane %v1284_v39, %v1970_v46  ;;  %v1992_v53 = vrot.slane %v1284_v39, %v1991_v48 }
  0xfe   : > { %4010 = vmatmul.mubr.msk.f32.vlgmr.msra.gmra.mxu0 %vm566_vm0, %v4565_v7  ;;  %4021 = vmatmul.mubr.msk.f32.vlgmr.msra.gmra.mxu1 %vm566_vm0, %v4565_v7  ;;  %v4596_v18 = vrot.slane %v1288_v14, %v4568_v9  ;;  %v4608_v21 = vrot.slane %v4593_v17, %v4568_v9  ;;  %v1303_v44 = vcombine.high %v4593_v17, %v4593_v17 }
  0xff   : > { %4023 = vmatprep.subr.mxu0 %v4192_v2  ;;  %4034 = vmatprep.subr.mxu1 %v4192_v2  ;;  %v1985_v55 = vrot.slane %v1284_v39, %v1984_v51  ;;  %v2006_v57 = vrot.slane %v1284_v39, %v2005_v54  ;;  %v1999_v58 = vrot.slane %v1284_v39, %v1998_v56 }
 0x100   : > { %4024 = vmatpush3.msra.mxu0 %v2038_v11  ;;  %4035 = vmatpush3.msra.mxu1 %v2042_v12  ;;  %v1325_v49 = vrot.slane %v1303_v44, %v4568_v9  ;;  %v1318_v60 = vrot.slane %v4596_v18, %v4568_v9  ;;  %v1304_v61 = vcombine.high %v4596_v18, %v4596_v18 }
 0x101   : > { %4025 = vmatprep.subr.mxu0 %v4192_v2  ;;  %4036 = vmatprep.subr.mxu1 %v4192_v2  ;;  %v2013_v62 = vrot.slane %v1284_v39, %v2012_v59  ;;  %v1340_v3 = vrot.slane %v4608_v21, %v4692_v40  ;;  %v1333_v13 = vcombine.high %v4608_v21, %v4608_v21 }
 0x102   : > { %4026 = vmatpush3.msra.mxu0 %v2037_v15  ;;  %4037 = vmatpush3.msra.mxu1 %v2041_v16  ;;  %v1332_v63 = vrot.slane %v1304_v61, %v4568_v9  ;;  %v1344_v4 = vrot.slane %v1325_v49, %v4692_v40  ;;  %v1335_v14 = vcombine.high %v1325_v49, %v1325_v49 }
 0x103   : > { %4027 = vmatprep.subr.mxu0 %v4192_v2  ;;  %4038 = vmatprep.subr.mxu1 %v4192_v2  ;;  %v1348_v15 = vrot.slane %v1333_v13, %v4692_v40 }
 0x104   : > { %4028 = vmatpush3.msra.mxu0 %v2036_v19  ;;  %4039 = vmatpush3.msra.mxu1 %v2040_v20  ;;  %v1352_v16 = vrot.slane %v1335_v14, %v4692_v40 }
 0x105   : > { %4029 = vmatprep.subr.mxu0 %v4192_v2  ;;  %4040 = vmatprep.subr.mxu1 %v4192_v2 }
 0x106   : > { %4030 = vmatpush3.msra.mxu0 %v2035_v22  ;;  %4031 = vmatprep.mubr.msk.f32.mxu0 %vm4193_vm1, %v4192_v2 }
 0x107   : > { %4041 = vmatpush3.msra.mxu1 %v2039_v23  ;;  %4042 = vmatprep.mubr.msk.f32.mxu1 %vm4193_vm1, %v4192_v2 }
 0x108   : > { %4032 = vmatmul.mubr.msk.f32.vlgmr.msra.gmra.mxu0 %vm566_vm0, %v4565_v7  ;;  %4043 = vmatmul.mubr.msk.f32.vlgmr.msra.gmra.mxu1 %vm566_vm0, %v4565_v7 }
 0x109   : > { %4045 = vmatprep.subr.mxu0 %v4192_v2  ;;  %4056 = vmatprep.subr.mxu1 %v4192_v2 }
 0x10a   : > { %4046 = vmatpush3.msra.mxu0 %v2046_v24  ;;  %4057 = vmatpush3.msra.mxu1 %v2050_v25  ;;  %v1356_v24 = vrot.slane %v1318_v60, %v4692_v40  ;;  %v1360_v25 = vrot.slane %v1332_v63, %v4692_v40 }
 0x10b   : > { %4047 = vmatprep.subr.mxu0 %v4192_v2  ;;  %4058 = vmatprep.subr.mxu1 %v4192_v2 }
 0x10c   : > { %4048 = vmatpush3.msra.mxu0 %v2045_v26  ;;  %4059 = vmatpush3.msra.mxu1 %v2049_v27 }
 0x10d   : > { %4049 = vmatprep.subr.mxu0 %v4192_v2  ;;  %4060 = vmatprep.subr.mxu1 %v4192_v2 }
 0x10e   : > { %4050 = vmatpush3.msra.mxu0 %v2044_v28  ;;  %4061 = vmatpush3.msra.mxu1 %v2048_v29 }
 0x10f   : > { %4051 = vmatprep.subr.mxu0 %v4192_v2  ;;  %4062 = vmatprep.subr.mxu1 %v4192_v2 }
 0x110   : > { %4052 = vmatpush3.msra.mxu0 %v2043_v30  ;;  %4053 = vmatprep.mubr.msk.f32.mxu0 %vm4193_vm1, %v4192_v2 }
 0x111   : > { %4063 = vmatpush3.msra.mxu1 %v2047_v31  ;;  %4064 = vmatprep.mubr.msk.f32.mxu1 %vm4193_vm1, %v4192_v2  ;;  %v1334_v31 = vcombine.high %v1318_v60, %v1318_v60 }
 0x112   : > { %4054 = vmatmul.mubr.msk.f32.vlgmr.msra.gmra.mxu0 %vm566_vm0, %v4565_v7  ;;  %4065 = vmatmul.mubr.msk.f32.vlgmr.msra.gmra.mxu1 %vm566_vm0, %v4565_v7 }
 0x113   : > { %4067 = vmatprep.subr.mxu0 %v4192_v2  ;;  %4078 = vmatprep.subr.mxu1 %v4192_v2 }
 0x114   : > { %4068 = vmatpush3.msra.mxu0 %v2054_v32  ;;  %4079 = vmatpush3.msra.mxu1 %v2058_v33  ;;  %v1336_v32 = vcombine.high %v1332_v63, %v1332_v63  ;;  %v1364_v33 = vrot.slane %v1334_v31, %v4692_v40 }
 0x115   : > { %4069 = vmatprep.subr.mxu0 %v4192_v2  ;;  %4080 = vmatprep.subr.mxu1 %v4192_v2 }
 0x116   : > { %4070 = vmatpush3.msra.mxu0 %v2053_v35  ;;  %4081 = vmatpush3.msra.mxu1 %v2057_v36  ;;  %v1368_v34 = vrot.slane %v1336_v32, %v4692_v40 }
 0x117   : > { %4071 = vmatprep.subr.mxu0 %v4192_v2  ;;  %4082 = vmatprep.subr.mxu1 %v4192_v2 }
 0x118   : > { %4072 = vmatpush3.msra.mxu0 %v2052_v37  ;;  %4083 = vmatpush3.msra.mxu1 %v2056_v38 }
 0x119   : > { %4073 = vmatprep.subr.mxu0 %v4192_v2  ;;  %4084 = vmatprep.subr.mxu1 %v4192_v2 }
 0x11a   : > { %4074 = vmatpush3.msra.mxu0 %v2051_v41  ;;  %4075 = vmatprep.mubr.msk.f32.mxu0 %vm4193_vm1, %v4192_v2 }
 0x11b   : > { %4085 = vmatpush3.msra.mxu1 %v2055_v43  ;;  %4086 = vmatprep.mubr.msk.f32.mxu1 %vm4193_vm1, %v4192_v2 }
 0x11c   : > { %4076 = vmatmul.mubr.msk.f32.vlgmr.msra.gmra.mxu0 %vm566_vm0, %v4565_v7  ;;  %4087 = vmatmul.mubr.msk.f32.vlgmr.msra.gmra.mxu1 %vm566_vm0, %v4565_v7 }
 0x11d   : > { %1966 = vbcast.lane.b32.xlu1 %v1964_v45, 256  ;;  %4094 = vmatprep.subr.mxu1 %v4192_v2 }
 0x11e   : > { %4095 = vmatpush3.xpose.msk.msra.mxu1 %vm566_vm0, %v4565_v7  ;;  %4096 = vmatprep.mubr.msk.f32.mxu1 %vm4193_vm1, %v4192_v2 }
 0x11f   : > { %1980 = vbcast.lane.b32.xlu0 %v1978_v47, 256  ;;  %4089 = vmatprep.subr.mxu0 %v4192_v2 }
 0x120   : > { %4091 = vmatprep.mubr.msk.f32.mxu0 %vm4193_vm1, %v4192_v2  ;;  %4104 = vmatprep.subr.mxu1 %v4192_v2 }
 0x121   : > { %1973 = vbcast.lane.b32.xlu1 %v1971_v50, 256  ;;  %4097 = vmatmul.mubr.msk.f32.vlgmr.msra.gmra.mxu1 %vm566_vm0, %v2699_v52 }
 0x122   : > { %4106 = vmatprep.mubr.msk.f32.mxu1 %vm4193_vm1, %v4192_v2  ;;  %4090 = vmatpush3.xpose.msk.msra.mxu0 %vm566_vm0, %v4761_v0 }
 0x123   : > { %1994 = vbcast.lane.b32.xlu0 %v1992_v53, 256  ;;  %4105 = vmatpush3.xpose.msk.msra.mxu1 %vm566_vm0, %v4761_v0 }
 0x124   : > { %4099 = vmatprep.subr.mxu0 %v4192_v2  ;;  %4114 = vmatprep.subr.mxu1 %v4192_v2 }
 0x125   : > { %1987 = vbcast.lane.b32.xlu1 %v1985_v55, 256  ;;  %4092 = vmatmul.mubr.msk.f32.vlgmr.msra.gmra.mxu0 %vm566_vm0, %v2622_v1 }
 0x126   : > { %4100 = vmatpush3.xpose.msk.msra.mxu0 %vm566_vm0, %v4761_v0  ;;  %4101 = vmatprep.mubr.msk.f32.mxu0 %vm4193_vm1, %v4192_v2 }
 0x127   : > { %2008 = vbcast.lane.b32.xlu0 %v2006_v57, 256  ;;  %4109 = vmatprep.subr.mxu0 %v4192_v2 }
 0x129   : > { %2001 = vbcast.lane.b32.xlu1 %v1999_v58, 256 }
 0x12d   : > { %2015 = vbcast.lane.b32.xlu1 %v2013_v62, 256 }
 0x197   : > { %v1446_v6 = vpop.f32.mrf.mxu0  ;;  %v1519_v7 = vpop.f32.mrf.mxu1 }
 0x198   : > { %v4781_v8 = vadd.f32 %v1446_v6, %v1340_v3  ;;  %v4783_v10 = vadd.f32 %v1519_v7, %v1344_v4  ;;  %v2704_v3 = vpop.permute.xlu0 %2703 }
 0x199   : > { %v3965_v11 = vpop.f32.mrf.mxu0  ;;  %v3970_v12 = vpop.f32.mrf.mxu1 }
 0x1a1   : > { %v1592_v17 = vpop.f32.mrf.mxu0  ;;  %v1665_v18 = vpop.f32.mrf.mxu1 }
 0x1a2   : > { %v4789_v19 = vadd.f32 %v1592_v17, %v1348_v15  ;;  %v4791_v20 = vadd.f32 %v1665_v18, %v1352_v16 }
 0x1a3   : > { %v3975_v22 = vpop.f32.mrf.mxu0  ;;  %v3980_v23 = vpop.f32.mrf.mxu1 }
 0x1ab   : > { %v1738_v26 = vpop.f32.mrf.mxu0  ;;  %v1811_v27 = vpop.f32.mrf.mxu1 }
 0x1ac   : > { %v4795_v21 = vadd.f32 %v1738_v26, %v1356_v24  ;;  %v4797_v28 = vadd.f32 %v1811_v27, %v1360_v25  ;;  %v1981_v25 = vpop.permute.xlu0 %1980 }
 0x1ad   : > { %v3985_v29 = vpop.f32.mrf.mxu0  ;;  %v3990_v30 = vpop.f32.mrf.mxu1 }
 0x1b0   : > { %v1995_v27 = vpop.permute.xlu0 %1994 }
 0x1b4   : > { %v4866_v30 = vpop.permute.xlu0 %2008 }
 0x1b5   : > { %v1884_v35 = vpop.f32.mrf.mxu0  ;;  %v1957_v36 = vpop.f32.mrf.mxu1 }
 0x1b6   : > { %v4801_v37 = vadd.f32 %v1884_v35, %v1364_v33  ;;  %v4803_v38 = vadd.f32 %v1957_v36, %v1368_v34 }
 0x1b7   : > { %v3995_v39 = vpop.f32.mrf.mxu0  ;;  %v4000_v41 = vpop.f32.mrf.mxu1 }
 0x1be   : > { %v2128_v43 = vpop.f32.mrf.mxu0  ;;  %v2198_v44 = vpop.f32.mrf.mxu1 }
 0x1bf   : > { %4102 = vmatmul.mubr.msk.f32.vlgmr.msra.gmra.mxu0 %vm566_vm0, %v2128_v43  ;;  %4107 = vmatmul.mubr.msk.f32.vlgmr.msra.gmra.mxu1 %vm566_vm0, %v2198_v44 }
 0x1c0   : > { %v4011_v45 = vpop.f32.mrf.mxu0  ;;  %v4022_v47 = vpop.f32.mrf.mxu1  ;;  %4110 = vmatpush3.xpose.msk.msra.mxu0 %vm566_vm0, %v4761_v0  ;;  %4115 = vmatpush3.xpose.msk.msra.mxu1 %vm566_vm0, %v4761_v0 }
 0x1c1   : > { %4111 = vmatprep.mubr.msk.f32.mxu0 %vm4193_vm1, %v4192_v2  ;;  %4116 = vmatprep.mubr.msk.f32.mxu1 %vm4193_vm1, %v4192_v2  ;;  %v4874_v45 = vstv %s3518_s22  ;;  %v4876_v47 = vstv %s3517_s25 }
 0x1c2   : > { %4119 = vmatprep.subr.mxu0 %v4192_v2  ;;  %4124 = vmatprep.subr.mxu1 %v4192_v2 }
 0x1c8   : > { %v2268_v49 = vpop.f32.mrf.mxu0  ;;  %v2338_v50 = vpop.f32.mrf.mxu1 }
 0x1c9   : > { %4112 = vmatmul.mubr.msk.f32.vlgmr.msra.gmra.mxu0 %vm566_vm0, %v2268_v49  ;;  %4117 = vmatmul.mubr.msk.f32.vlgmr.msra.gmra.mxu1 %vm566_vm0, %v2338_v50 }
 0x1ca   : > { %v4033_v52 = vpop.f32.mrf.mxu0  ;;  %v4044_v53 = vpop.f32.mrf.mxu1  ;;  %4120 = vmatpush3.xpose.msk.msra.mxu0 %vm566_vm0, %v4761_v0  ;;  %4125 = vmatpush3.xpose.msk.msra.mxu1 %vm566_vm0, %v4761_v0 }
 0x1cb   : > { %4121 = vmatprep.mubr.msk.f32.mxu0 %vm4193_vm1, %v4192_v2  ;;  %4126 = vmatprep.mubr.msk.f32.mxu1 %vm4193_vm1, %v4192_v2 }
 0x1cc   : > { %4129 = vmatprep.subr.mxu0 %v4192_v2  ;;  %4134 = vmatprep.subr.mxu1 %v4192_v2 }
 0x1d2   : > { %v2408_v55 = vpop.f32.mrf.mxu0  ;;  %v2478_v57 = vpop.f32.mrf.mxu1 }
 0x1d3   : > { %4122 = vmatmul.mubr.msk.f32.vlgmr.msra.gmra.mxu0 %vm566_vm0, %v2408_v55  ;;  %4127 = vmatmul.mubr.msk.f32.vlgmr.msra.gmra.mxu1 %vm566_vm0, %v2478_v57 }
 0x1d4   : > { %v4055_v58 = vpop.f32.mrf.mxu0  ;;  %v4066_v60 = vpop.f32.mrf.mxu1  ;;  %4130 = vmatpush3.xpose.msk.msra.mxu0 %vm566_vm0, %v4761_v0  ;;  %4135 = vmatpush3.xpose.msk.msra.mxu1 %vm566_vm0, %v4761_v0 }
 0x1d5   : > { %4131 = vmatprep.mubr.msk.f32.mxu0 %vm4193_vm1, %v4192_v2  ;;  %4136 = vmatprep.mubr.msk.f32.mxu1 %vm4193_vm1, %v4192_v2 }
 0x1dc   : > { %v2548_v61 = vpop.f32.mrf.mxu0  ;;  %v2618_v62 = vpop.f32.mrf.mxu1 }
 0x1dd   : > { %4132 = vmatmul.mubr.msk.f32.vlgmr.msra.gmra.mxu0 %vm566_vm0, %v2548_v61  ;;  %4137 = vmatmul.mubr.msk.f32.vlgmr.msra.gmra.mxu1 %vm566_vm0, %v2618_v62 }
 0x1de   : > { %v4077_v63 = vpop.f32.mrf.mxu0  ;;  %v4088_v1 = vpop.f32.mrf.mxu1 }
 0x1e1   : > { %v2775_v4 = vpop.f32.mrf.mxu1 }
 0x1e2   : > { %v2776_v6 = vadd.f32 %v2775_v4, %v2704_v3 }
 0x1e3   : > { %v4098_v7 = vpop.f32.mrf.mxu1 }
 0x1e4   : > { %v3463_v0 = vrot.slane %v2776_v6, %v1970_v46  ;;  %v3456_v11 = vrot.slane %v2776_v6, %v4692_v40  ;;  %v3477_v2 = vrot.slane %v2776_v6, %v1984_v51  ;;  %v3470_v12 = vrot.slane %v2776_v6, %v1977_v42 }
 0x1e5   : > { %v3491_v13 = vrot.slane %v2776_v6, %v1998_v56  ;;  %v3484_v14 = vrot.slane %v2776_v6, %v1991_v48  ;;  %v3505_v46 = vrot.slane %v2776_v6, %v2012_v59  ;;  %v3498_v15 = vrot.slane %v2776_v6, %v2005_v54  ;;  %v2695_v51 = vpop.f32.mrf.mxu0  ;;  %v1967_v54 = vpop.permute.xlu1 %1966 }
 0x1e6   : > { %3465 = vbcast.lane.b32.xlu1 %v3463_v0, 256  ;;  %3458 = vbcast.lane.b32.xlu0 %v3456_v11, 256  ;;  %v2780_v42 = vcombine.high %v2695_v51, %v2695_v51  ;;  %v2787_v16 = vrot.slane %v2695_v51, %v4568_v9  ;;  %v2017_v35 = vadd.f32 %v1967_v54, %v4781_v8 }
 0x1e7   : > { %v4093_v17 = vpop.f32.mrf.mxu0  ;;  %v2019_v6 = vadd.f32 %v1981_v25, %v4789_v19 }
 0x1e8   : > { %v2794_v56 = vrot.slane %v2780_v42, %v4568_v9  ;;  %v2803_v18 = vrot.slane %v2787_v16, %v4568_v9  ;;  %v2795_v48 = vcombine.high %v2787_v16, %v2787_v16  ;;  %v3520_v58 = vmul.f32 %v4874_v45, %v2017_v35 }
 0x1e9   : > { %v1974_v24 = vpop.permute.xlu1 %1973  ;;  %v3522_v51 = vmul.f32 %v4874_v45, %v2019_v6 }
 0x1ea   : > { %3479 = vbcast.lane.b32.xlu1 %v3477_v2, 256  ;;  %3472 = vbcast.lane.b32.xlu0 %v3470_v12, 256  ;;  %v2817_v22 = vrot.slane %v2795_v48, %v4568_v9  ;;  %v2796_v23 = vcombine.high %v2794_v56, %v2794_v56  ;;  %v4861_v59 = vrot.slane %v2794_v56, %v4568_v9 }
 0x1eb   : > { %v2832_v32 = vrot.slane %v2803_v18, %v4692_v40  ;;  %v2018_v36 = vadd.f32 %v1974_v24, %v4783_v10  ;;  %v2825_v55 = vcombine.high %v2803_v18, %v2803_v18  ;;  %v2021_v48 = vadd.f32 %v1995_v27, %v4795_v21 }
 0x1ec   : > { %v4864_v5 = vrot.slane %v2796_v23, %v4568_v9  ;;  %v2836_v33 = vrot.slane %v2817_v22, %v4692_v40  ;;  %v2827_v57 = vcombine.high %v2817_v22, %v2817_v22  ;;  %v2848_v56 = vrot.slane %v4861_v59, %v4692_v40 }
 0x1ed   : > { %v1988_v26 = vpop.permute.xlu1 %1987  ;;  %v3521_v8 = vmul.f32 %v4874_v45, %v2018_v36  ;;  %v2840_v63 = vrot.slane %v2825_v55, %v4692_v40  ;;  %v3524_v36 = vmul.f32 %v4874_v45, %v2021_v48  ;;  %v2826_v27 = vcombine.high %v4861_v59, %v4861_v59 }
 0x1ee   : > { %3493 = vbcast.lane.b32.xlu1 %v3491_v13, 256  ;;  %3486 = vbcast.lane.b32.xlu0 %v3484_v14, 256  ;;  %v2844_v1 = vrot.slane %v2827_v57, %v4692_v40  ;;  %v2020_v7 = vadd.f32 %v1988_v26, %v4791_v20  ;;  %v2852_v18 = vrot.slane %v4864_v5, %v4692_v40 }
 0x1f0   : > { %v3523_v42 = vmul.f32 %v4874_v45, %v2020_v7 }
 0x1f1   : > { %v2002_v29 = vpop.permute.xlu1 %2001 }
 0x1f2   : > { %3507 = vbcast.lane.b32.xlu1 %v3505_v46, 256  ;;  %3500 = vbcast.lane.b32.xlu0 %v3498_v15, 256  ;;  %v2022_v22 = vadd.f32 %v2002_v29, %v4797_v28  ;;  %v2828_v29 = vcombine.high %v4864_v5, %v4864_v5 }
 0x1f5   : > { %v4868_v31 = vpop.permute.xlu1 %2015 }
 0x1f6   : > { %v2024_v59 = vadd.f32 %v4868_v31, %v4803_v38 }
 0x258   : > { %v3466_v39 = vpop.permute.xlu1 %3465  ;;  %v3459_v41 = vpop.permute.xlu0 %3458 }
 0x25c   : > { %v3480_v0 = vpop.permute.xlu1 %3479  ;;  %v3473_v11 = vpop.permute.xlu0 %3472 }
 0x260   : > { %v3494_v24 = vpop.permute.xlu1 %3493  ;;  %v3487_v25 = vpop.permute.xlu0 %3486 }
 0x264   : > { %v3508_v5 = vpop.permute.xlu1 %3507  ;;  %v3501_v55 = vpop.permute.xlu0 %3500 }
 0x27f   : > { %v2938_v34 = vpop.f32.mrf.mxu0  ;;  %v3011_v9 = vpop.f32.mrf.mxu1 }
 0x280   : > { %v2939_v43 = vadd.f32 %v2938_v34, %v2832_v32  ;;  %v3012_v44 = vadd.f32 %v3011_v9, %v2836_v33 }
 0x281   : > { %v4103_v49 = vpop.f32.mrf.mxu0  ;;  %v4108_v50 = vpop.f32.mrf.mxu1 }
 0x282   : > { %v3509_v52 = vadd.f32 %v3459_v41, %v2939_v43  ;;  %v3510_v53 = vadd.f32 %v3466_v39, %v3012_v44  ;;  %v3525_v39 = vmul.f32 %v4874_v45, %v2022_v22  ;;  %v2856_v44 = vrot.slane %v2826_v27, %v4692_v40 }
 0x283   : > { %v2860_v49 = vrot.slane %v2828_v29, %v4692_v40 }
 0x284   : > { %v3529_v10 = vmul.f32 %v4876_v47, %v3509_v52  ;;  %v3530_v60 = vmul.f32 %v4876_v47, %v3510_v53  ;;  %v2023_v53 = vadd.f32 %v4866_v30, %v4801_v37 }
 0x286   : > { %v3537_v61 = vadd.f32 %v3529_v10, %v3520_v58  ;;  %v3538_v62 = vadd.f32 %v3530_v60, %v3521_v8  ;;  %v3526_v40 = vmul.f32 %v4874_v45, %v2023_v53 }
 0x288   : > { %3546 = vst.msk [vmem:[%s4886_s30] sm:$0xff] %vm3545_vm2, %v3537_v61  ;;  %3547 = vst.msk [vmem:[%s4886_s30 + $0x8] sm:$0xff] %vm3545_vm2, %v3538_v62  ;;  %v3527_v62 = vmul.f32 %v4874_v45, %v2024_v59 }
 0x289   : > { %v3084_v3 = vpop.f32.mrf.mxu0  ;;  %v3157_v4 = vpop.f32.mrf.mxu1 }
 0x28a   : > { %v3085_v2 = vadd.f32 %v3084_v3, %v2840_v63  ;;  %v3158_v12 = vadd.f32 %v3157_v4, %v2844_v1 }
 0x28b   : > { %v4113_v13 = vpop.f32.mrf.mxu0  ;;  %v4118_v14 = vpop.f32.mrf.mxu1 }
 0x28c   : > { %v3511_v46 = vadd.f32 %v3473_v11, %v3085_v2  ;;  %v3512_v15 = vadd.f32 %v3480_v0, %v3158_v12 }
 0x28e   : > { %v3531_v16 = vmul.f32 %v4876_v47, %v3511_v46  ;;  %v3532_v19 = vmul.f32 %v4876_v47, %v3512_v15 }
 0x290   : > { %v3539_v17 = vadd.f32 %v3531_v16, %v3522_v51  ;;  %v3540_v20 = vadd.f32 %v3532_v19, %v3523_v42 }
 0x292   : > { %3548 = vst.msk [vmem:[%s4886_s30 + $0x10] sm:$0xff] %vm3545_vm2, %v3539_v17  ;;  %3549 = vst.msk [vmem:[%s4886_s30 + $0x18] sm:$0xff] %vm3545_vm2, %v3540_v20 }
 0x293   : > { %v3230_v23 = vpop.f32.mrf.mxu0  ;;  %v3303_v54 = vpop.f32.mrf.mxu1 }
 0x294   : > { %v3231_v26 = vadd.f32 %v3230_v23, %v2848_v56  ;;  %v3304_v32 = vadd.f32 %v3303_v54, %v2852_v18 }
 0x295   : > { %v4123_v33 = vpop.f32.mrf.mxu0  ;;  %v4128_v34 = vpop.f32.mrf.mxu1 }
 0x296   : > { %v3513_v9 = vadd.f32 %v3487_v25, %v3231_v26  ;;  %v3514_v35 = vadd.f32 %v3494_v24, %v3304_v32 }
 0x298   : > { %v3533_v21 = vmul.f32 %v4876_v47, %v3513_v9  ;;  %v3534_v28 = vmul.f32 %v4876_v47, %v3514_v35 }
 0x29a   : > { %v3541_v41 = vadd.f32 %v3533_v21, %v3524_v36  ;;  %v3542_v43 = vadd.f32 %v3534_v28, %v3525_v39 }
 0x29c   : > { %3550 = vst.msk [vmem:[%s4886_s30 + $0x20] sm:$0xff] %vm3545_vm2, %v3541_v41  ;;  %3551 = vst.msk [vmem:[%s4886_s30 + $0x28] sm:$0xff] %vm3545_vm2, %v3542_v43 }
 0x29d   : > { %v3376_v50 = vpop.f32.mrf.mxu0  ;;  %v3449_v52 = vpop.f32.mrf.mxu1 }
 0x29e   : > { %v3377_v57 = vadd.f32 %v3376_v50, %v2856_v44  ;;  %v3450_v58 = vadd.f32 %v3449_v52, %v2860_v49 }
 0x29f   : > { %v4133_v8 = vpop.f32.mrf.mxu0  ;;  %v4138_v10 = vpop.f32.mrf.mxu1 }
 0x2a0   : > { %v3515_v60 = vadd.f32 %v3501_v55, %v3377_v57  ;;  %v3516_v61 = vadd.f32 %v3508_v5, %v3450_v58 }
 0x2a2   : > { %v3535_v63 = vmul.f32 %v4876_v47, %v3515_v60  ;;  %v3536_v37 = vmul.f32 %v4876_v47, %v3516_v61 }
 0x2a4   : > { %v3543_v30 = vadd.f32 %v3535_v63, %v3526_v40  ;;  %v3544_v1 = vadd.f32 %v3536_v37, %v3527_v62 }
 0x2a6   : > { %3552 = vst.msk [vmem:[%s4886_s30 + $0x30] sm:$0xff] %vm3545_vm2, %v3543_v30  ;;  %3553 = vst.msk [vmem:[%s4886_s30 + $0x38] sm:$0xff] %vm3545_vm2, %v3544_v1 }
 0x2a7 PF: > { %s24_s29 = sadd.s32 1, %s4190_s29   ;;  %s4959_s27 = smov %s4186_s28 }
 0x2a8   : > { %p21_p5 = scmp.ge.s32.totalorder %s24_s29, 4   ;;  %s4960_s28 = smov %s4962_s0 }
 0x2aa   :  { %23 = sbr.rel (!%p21_p5) target bundleno = 2 (0x2), region = 111 }

</bundles_post_ra>
